<compile_context>
chip_gen: v5e
topology: v5e:2x2
jax: 0.10.0
libtpu: 0.0.40
codegen_flags: <defaults>
</compile_context>

<pallas_src>
import jax
import jax.numpy as jnp
from jax.experimental import pallas as pl
from jax.experimental.pallas import tpu as pltpu


_ACT_DTYPE = jnp.bfloat16   # MXU-native input dtype; accumulation stays f32 in-kernel.


# ---------------------------------------------------------------------------
# helpers
# ---------------------------------------------------------------------------
def _fold_bn(gamma, beta, mean, var, eps=1e-5):
    """Fold inference-mode BatchNorm into per-channel (scale, bias)."""
    scale = gamma / jnp.sqrt(var + eps)
    bias = beta - mean * scale
    return scale.astype(jnp.float32), bias.astype(jnp.float32)


# ---------------------------------------------------------------------------
# fused  im2col-matmul + bias + residual + ReLU (+ avgpool)  kernel
# ---------------------------------------------------------------------------
def _make_conv_kernel(fuse_residual: bool, apply_relu: bool, fuse_avgpool: bool):
    def epilogue(acc, b, r):
        y = acc + b                                   # folded-BN bias (f32)
        if r is not None:
            y = y + r.astype(jnp.float32)             # residual add
        if apply_relu:
            y = jnp.maximum(y, 0.0)
        return y

    def store(y, o_ref):
        if fuse_avgpool:
            pooled = jnp.mean(y, axis=0, keepdims=True)          # (1, Cout)
            o_ref[...] = jnp.broadcast_to(pooled, o_ref.shape).astype(o_ref.dtype)
        else:
            o_ref[...] = y.astype(o_ref.dtype)

    if fuse_residual:
        def kernel(x_ref, w_ref, b_ref, r_ref, o_ref):
            acc = jnp.dot(x_ref[...], w_ref[...],
                          preferred_element_type=jnp.float32)     # (HW, Cout) f32
            store(epilogue(acc, b_ref[...], r_ref[...]), o_ref)
    else:
        def kernel(x_ref, w_ref, b_ref, o_ref):
            acc = jnp.dot(x_ref[...], w_ref[...],
                          preferred_element_type=jnp.float32)
            store(epilogue(acc, b_ref[...], None), o_ref)

    return kernel


def _conv_bn(x_nhwc, w_hwio, scale, bias, *, stride, apply_relu,
             residual=None, fuse_avgpool=False, out_dtype=None):
    """KxK conv (pad=(K-1)//2) + folded BN + optional residual + ReLU (+ avgpool).

    One Pallas grid step per image: (HW, kh*kw*Cin) @ (kh*kw*Cin, Cout) on the MXU.
    """
    N, H, W, Cin = x_nhwc.shape
    kh, kw, _, Cout = w_hwio.shape
    pad = (kh - 1) // 2
    Ho = (H + 2 * pad - kh) // stride + 1
    Wo = (W + 2 * pad - kw) // stride + 1
    HWo = Ho * Wo
    K = kh * kw * Cin
    out_dtype = out_dtype if out_dtype is not None else x_nhwc.dtype

    # --- im2col in bf16 (XLA-side layout plumbing; heavy work is in the kernel) ---
    xb = x_nhwc.astype(_ACT_DTYPE)
    xp = jnp.pad(xb, ((0, 0), (pad, pad), (pad, pad), (0, 0))) if pad else xb
    cols = []
    for i in range(kh):
        for j in range(kw):
            cols.append(xp[:, i:i + (Ho - 1) * stride + 1:stride,
                            j:j + (Wo - 1) * stride + 1:stride, :])
    im2col = jnp.concatenate(cols, axis=-1).reshape(N, HWo, K)     # (N, HW, K) bf16

    # --- fold BN scale into the weights -> epilogue is bias(+res)(+ReLU) only ---
    w2 = (w_hwio.reshape(K, Cout).astype(jnp.float32)
          * scale.reshape(1, Cout)).astype(_ACT_DTYPE)             # (K, Cout) bf16
    b2 = bias.reshape(1, Cout).astype(jnp.float32)                 # (1, Cout) f32

    in_specs = [
        pl.BlockSpec((None, HWo, K), lambda n: (n, 0, 0)),   # per-image im2col
        pl.BlockSpec((K, Cout), lambda n: (0, 0)),           # resident folded weights
        pl.BlockSpec((1, Cout), lambda n: (0, 0)),           # resident bias
    ]
    args = [im2col, w2, b2]
    if residual is not None:
        res = residual.reshape(N, HWo, Cout)
        in_specs.append(pl.BlockSpec((None, HWo, Cout), lambda n: (n, 0, 0)))
        args.append(res)

    if fuse_avgpool:
        # sublane-aligned (8 rows) per-image output slab; row 0 holds the pooled vector
        out_shape = jax.ShapeDtypeStruct((N, 8, Cout), out_dtype)
        out_spec = pl.BlockSpec((None, 8, Cout), lambda n: (n, 0, 0))
    else:
        out_shape = jax.ShapeDtypeStruct((N, HWo, Cout), out_dtype)
        out_spec = pl.BlockSpec((None, HWo, Cout), lambda n: (n, 0, 0))

    kernel = _make_conv_kernel(residual is not None, apply_relu, fuse_avgpool)

    out = pl.pallas_call(
        kernel,
        out_shape=out_shape,
        grid_spec=pltpu.PrefetchScalarGridSpec(
            num_scalar_prefetch=0,
            grid=(N,),                       # >= 2 parallel tiles -> both v7x TCs busy
            in_specs=in_specs,
            out_specs=out_spec,
        ),
        compiler_params=pltpu.CompilerParams(
            dimension_semantics=("parallel",)),
    )(*args)

    if fuse_avgpool:
        return out[:, 0, :]                  # (N, Cout) == flatten(avgpool(...))
    return out.reshape(N, Ho, Wo, Cout)


# ---------------------------------------------------------------------------
# full forward: layer4 (2 BasicBlocks) -> avgpool -> flatten
# ---------------------------------------------------------------------------
def specialized_resnet_imagenet_forward(x_nchw, params):
    in_dtype = x_nchw.dtype
    x = jnp.transpose(x_nchw, (0, 2, 3, 1))  # NCHW -> NHWC

    # ---- layer4, block 0 (stride 2, conv1x1 downsample shortcut) ----
    out = _conv_bn(x, params["b0_conv1_w"], *params["b0_bn1"],
                   stride=2, apply_relu=True, out_dtype=_ACT_DTYPE)
    identity = _conv_bn(x, params["b0_down_w"], *params["b0_down_bn"],
                        stride=2, apply_relu=False, out_dtype=_ACT_DTYPE)
    out = _conv_bn(out, params["b0_conv2_w"], *params["b0_bn2"],
                   stride=1, apply_relu=True, residual=identity,
                   out_dtype=_ACT_DTYPE)

    # ---- layer4, block 1 (stride 1, identity shortcut) ----
    out2 = _conv_bn(out, params["b1_conv1_w"], *params["b1_bn1"],
                    stride=1, apply_relu=True, out_dtype=_ACT_DTYPE)

    # ---- last conv: residual + ReLU + AdaptiveAvgPool2d((1,1)) + flatten, fused ----
    feats = _conv_bn(out2, params["b1_conv2_w"], *params["b1_bn2"],
                     stride=1, apply_relu=True, residual=out,
                     fuse_avgpool=True, out_dtype=in_dtype)
    return feats


# ---------------------------------------------------------------------------
# parameter construction (kaiming conv init, BN params), pure-JAX reference
# ---------------------------------------------------------------------------
def _make_params(key, cin, planes, dtype=jnp.float32):
    ks = list(jax.random.split(key, 12))

    def kaiming(k, kh, kw, ci, co):
        fan_out = kh * kw * co
        std = (2.0 / fan_out) ** 0.5
        return (jax.random.normal(k, (kh, kw, ci, co)) * std).astype(dtype)

    def bn(k, c):
        k1, k2, k3 = jax.random.split(k, 3)
        gamma = 1.0 + 0.1 * jax.random.normal(k1, (c,))
        beta = 0.1 * jax.random.normal(k2, (c,))
        mean = 0.1 * jax.random.normal(k3, (c,))
        var = jnp.ones((c,)) * 0.9
        return _fold_bn(gamma, beta, mean, var)

    return {
        "b0_conv1_w": kaiming(ks[0], 3, 3, cin, planes),
        "b0_bn1": bn(ks[1], planes),
        "b0_conv2_w": kaiming(ks[2], 3, 3, planes, planes),
        "b0_bn2": bn(ks[3], planes),
        "b0_down_w": kaiming(ks[4], 1, 1, cin, planes),
        "b0_down_bn": bn(ks[5], planes),
        "b1_conv1_w": kaiming(ks[6], 3, 3, planes, planes),
        "b1_bn1": bn(ks[7], planes),
        "b1_conv2_w": kaiming(ks[8], 3, 3, planes, planes),
        "b1_bn2": bn(ks[9], planes),
    }


def _ref_conv_bn(x, w, scale, bias, stride, apply_relu, residual=None):
    N, H, W, Cin = x.shape
    kh, kw, _, Cout = w.shape
    pad = (kh - 1) // 2
    Ho = (H + 2 * pad - kh) // stride + 1
    Wo = (W + 2 * pad - kw) // stride + 1
    xp = jnp.pad(x, ((0, 0), (pad, pad), (pad, pad), (0, 0))) if pad else x
    acc = jnp.zeros((N, Ho, Wo, Cout), jnp.float32)
    for i in range(kh):
        for j in range(kw):
            t = xp[:, i:i + (Ho - 1) * stride + 1:stride,
                   j:j + (Wo - 1) * stride + 1:stride, :]
            acc = acc + jnp.einsum("nhwc,cd->nhwd",
                                   t.astype(jnp.float32),
                                   w[i, j].astype(jnp.float32))
    y = acc * scale + bias
    if residual is not None:
        y = y + residual.astype(jnp.float32)
    if apply_relu:
        y = jnp.maximum(y, 0.0)
    return y


def _ref_forward(x_nchw, p):
    x = jnp.transpose(x_nchw, (0, 2, 3, 1)).astype(jnp.float32)
    out = _ref_conv_bn(x, p["b0_conv1_w"], *p["b0_bn1"], 2, True)
    idn = _ref_conv_bn(x, p["b0_down_w"], *p["b0_down_bn"], 2, False)
    out = _ref_conv_bn(out, p["b0_conv2_w"], *p["b0_bn2"], 1, True, residual=idn)
    out2 = _ref_conv_bn(out, p["b1_conv1_w"], *p["b1_bn1"], 1, True)
    out2 = _ref_conv_bn(out2, p["b1_conv2_w"], *p["b1_bn2"], 1, True, residual=out)
    return out2.mean(axis=(1, 2))


# ---------------------------------------------------------------------------
if __name__ == "__main__":
    key = jax.random.PRNGKey(0)
    kx, kp = jax.random.split(key)

    # Small shapes consistent with the module (scaled-down layer4 input):
    # NCHW activation feeding layer4, BasicBlock configuration.
    N, CIN, H, W = 2, 64, 8, 8
    PLANES = 128

    x = jax.random.normal(kx, (N, CIN, H, W), dtype=jnp.float32)
    params = _make_params(kp, CIN, PLANES)

    fwd = jax.jit(specialized_resnet_imagenet_forward)
    feats = fwd(x, params)
    jax.block_until_ready(feats)

    assert feats.shape == (N, PLANES), feats.shape
    assert feats.dtype == x.dtype

    feats_ref = _ref_forward(x, params)
    err = float(jnp.max(jnp.abs(feats.astype(jnp.float32) -
                                feats_ref.astype(jnp.float32))))
    ref_scale = float(jnp.max(jnp.abs(feats_ref))) + 1e-6
    assert err <= 0.05 * ref_scale + 1e-2, \
        f"mismatch: max|diff|={err}, ref_scale={ref_scale}"

    print("KERNEL_OK")
</pallas_src>

<mosaic_0001>
module attributes {stable_mosaic.version = 11 : i64} {
  func.func @kernel(%arg0: i32, %arg1: memref<1x16x64xbf16, #tpu.memory_space<vmem>>, %arg2: memref<64x128xbf16, #tpu.memory_space<vmem>>, %arg3: memref<1x128xf32, #tpu.memory_space<vmem>>, %arg4: memref<1x16x128xbf16, #tpu.memory_space<vmem>>) attributes {dimension_semantics = [#tpu.dimension_semantics<parallel>], iteration_bounds = array<i64: 2>, scalar_prefetch = 0 : i64, scratch_operands = 0 : i64, tpu.core_type = #tpu.core_type<tc>, window_params = [{transform_indices = @transform_0, window_bounds = array<i64: 1, 16, 64>}, {pipeline_mode = #tpu.pipeline_mode<synchronous>, transform_indices = @transform_1, window_bounds = array<i64: 64, 128>}, {pipeline_mode = #tpu.pipeline_mode<synchronous>, transform_indices = @transform_2, window_bounds = array<i64: 1, 128>}, {transform_indices = @transform_3, window_bounds = array<i64: 1, 16, 128>}]} {
    %c0 = arith.constant 0 : index
    %c0_0 = arith.constant 0 : index
    %c0_1 = arith.constant 0 : index
    %0 = vector.load %arg1[%c0, %c0_0, %c0_1] : memref<1x16x64xbf16, #tpu.memory_space<vmem>>, vector<1x16x64xbf16>
    %1 = vector.shape_cast %0 : vector<1x16x64xbf16> to vector<16x64xbf16>
    %c0_2 = arith.constant 0 : index
    %c0_3 = arith.constant 0 : index
    %2 = vector.load %arg2[%c0_2, %c0_3] : memref<64x128xbf16, #tpu.memory_space<vmem>>, vector<64x128xbf16>
    %cst = arith.constant dense<0.000000e+00> : vector<16x128xf32>
    %3 = tpu.matmul %1, %2, %cst {dimension_numbers = #tpu.dot_dimension_numbers<[1], [0], [0], [1], [0, 0, 1, 1], [], []>} : vector<16x64xbf16>, vector<64x128xbf16>, vector<16x128xf32> -> vector<16x128xf32>
    %c0_4 = arith.constant 0 : index
    %c0_5 = arith.constant 0 : index
    %4 = vector.load %arg3[%c0_4, %c0_5] : memref<1x128xf32, #tpu.memory_space<vmem>>, vector<1x128xf32>
    %5 = vector.broadcast %4 : vector<1x128xf32> to vector<16x128xf32>
    %6 = arith.addf %3, %5 : vector<16x128xf32>
    %7 = arith.truncf %6 : vector<16x128xf32> to vector<16x128xbf16>
    %c0_6 = arith.constant 0 : index
    %c0_7 = arith.constant 0 : index
    %c0_8 = arith.constant 0 : index
    %8 = vector.load %arg4[%c0_6, %c0_7, %c0_8] : memref<1x16x128xbf16, #tpu.memory_space<vmem>>, vector<1x16x128xbf16>
    %9 = vector.shape_cast %8 : vector<1x16x128xbf16> to vector<16x128xbf16>
    %10 = vector.shape_cast %7 : vector<16x128xbf16> to vector<1x16x128xbf16>
    tpu.vector_store %arg4[%c0_6, %c0_7, %c0_8], %10 {strides = array<i32>} : memref<1x16x128xbf16, #tpu.memory_space<vmem>>, vector<1x16x128xbf16>,
    return
  }
  func.func @transform_0(%arg0: i32) -> (i32, i32, i32) {
    %c0_i32 = arith.constant 0 : i32
    %c0_i32_0 = arith.constant 0 : i32
    %c0_i32_1 = arith.constant 0 : i32
    return %arg0, %c0_i32, %c0_i32_0 : i32, i32, i32
  }
  func.func @transform_1(%arg0: i32) -> (i32, i32) {
    %c0_i32 = arith.constant 0 : i32
    %c0_i32_0 = arith.constant 0 : i32
    %c0_i32_1 = arith.constant 0 : i32
    return %c0_i32, %c0_i32_0 : i32, i32
  }
  func.func @transform_2(%arg0: i32) -> (i32, i32) {
    %c0_i32 = arith.constant 0 : i32
    %c0_i32_0 = arith.constant 0 : i32
    %c0_i32_1 = arith.constant 0 : i32
    return %c0_i32, %c0_i32_0 : i32, i32
  }
  func.func @transform_3(%arg0: i32) -> (i32, i32, i32) {
    %c0_i32 = arith.constant 0 : i32
    %c0_i32_0 = arith.constant 0 : i32
    %c0_i32_1 = arith.constant 0 : i32
    return %arg0, %c0_i32, %c0_i32_0 : i32, i32, i32
  }
}

module attributes {stable_mosaic.version = 11 : i64} {
  func.func @kernel(%arg0: i32, %arg1: memref<1x16x576xbf16, #tpu.memory_space<vmem>>, %arg2: memref<576x128xbf16, #tpu.memory_space<vmem>>, %arg3: memref<1x128xf32, #tpu.memory_space<vmem>>, %arg4: memref<1x16x128xbf16, #tpu.memory_space<vmem>>) attributes {dimension_semantics = [#tpu.dimension_semantics<parallel>], iteration_bounds = array<i64: 2>, scalar_prefetch = 0 : i64, scratch_operands = 0 : i64, tpu.core_type = #tpu.core_type<tc>, window_params = [{transform_indices = @transform_0, window_bounds = array<i64: 1, 16, 576>}, {pipeline_mode = #tpu.pipeline_mode<synchronous>, transform_indices = @transform_1, window_bounds = array<i64: 576, 128>}, {pipeline_mode = #tpu.pipeline_mode<synchronous>, transform_indices = @transform_2, window_bounds = array<i64: 1, 128>}, {transform_indices = @transform_3, window_bounds = array<i64: 1, 16, 128>}]} {
    %c0 = arith.constant 0 : index
    %c0_0 = arith.constant 0 : index
    %c0_1 = arith.constant 0 : index
    %0 = vector.load %arg1[%c0, %c0_0, %c0_1] : memref<1x16x576xbf16, #tpu.memory_space<vmem>>, vector<1x16x576xbf16>
    %1 = vector.shape_cast %0 : vector<1x16x576xbf16> to vector<16x576xbf16>
    %c0_2 = arith.constant 0 : index
    %c0_3 = arith.constant 0 : index
    %2 = vector.load %arg2[%c0_2, %c0_3] : memref<576x128xbf16, #tpu.memory_space<vmem>>, vector<576x128xbf16>
    %cst = arith.constant dense<0.000000e+00> : vector<16x128xf32>
    %3 = tpu.matmul %1, %2, %cst {dimension_numbers = #tpu.dot_dimension_numbers<[1], [0], [0], [1], [0, 0, 1, 1], [], []>} : vector<16x576xbf16>, vector<576x128xbf16>, vector<16x128xf32> -> vector<16x128xf32>
    %c0_4 = arith.constant 0 : index
    %c0_5 = arith.constant 0 : index
    %4 = vector.load %arg3[%c0_4, %c0_5] : memref<1x128xf32, #tpu.memory_space<vmem>>, vector<1x128xf32>
    %5 = vector.broadcast %4 : vector<1x128xf32> to vector<16x128xf32>
    %6 = arith.addf %3, %5 : vector<16x128xf32>
    %cst_6 = arith.constant 0.000000e+00 : f32
    %7 = vector.broadcast %cst_6 : f32 to vector<16x128xf32>
    %8 = arith.maximumf %6, %7 : vector<16x128xf32>
    %9 = arith.truncf %8 : vector<16x128xf32> to vector<16x128xbf16>
    %c0_7 = arith.constant 0 : index
    %c0_8 = arith.constant 0 : index
    %c0_9 = arith.constant 0 : index
    %10 = vector.load %arg4[%c0_7, %c0_8, %c0_9] : memref<1x16x128xbf16, #tpu.memory_space<vmem>>, vector<1x16x128xbf16>
    %11 = vector.shape_cast %10 : vector<1x16x128xbf16> to vector<16x128xbf16>
    %12 = vector.shape_cast %9 : vector<16x128xbf16> to vector<1x16x128xbf16>
    tpu.vector_store %arg4[%c0_7, %c0_8, %c0_9], %12 {strides = array<i32>} : memref<1x16x128xbf16, #tpu.memory_space<vmem>>, vector<1x16x128xbf16>,
    return
  }
  func.func @transform_0(%arg0: i32) -> (i32, i32, i32) {
    %c0_i32 = arith.constant 0 : i32
    %c0_i32_0 = arith.constant 0 : i32
    %c0_i32_1 = arith.constant 0 : i32
    return %arg0, %c0_i32, %c0_i32_0 : i32, i32, i32
  }
  func.func @transform_1(%arg0: i32) -> (i32, i32) {
    %c0_i32 = arith.constant 0 : i32
    %c0_i32_0 = arith.constant 0 : i32
    %c0_i32_1 = arith.constant 0 : i32
    return %c0_i32, %c0_i32_0 : i32, i32
  }
  func.func @transform_2(%arg0: i32) -> (i32, i32) {
    %c0_i32 = arith.constant 0 : i32
    %c0_i32_0 = arith.constant 0 : i32
    %c0_i32_1 = arith.constant 0 : i32
    return %c0_i32, %c0_i32_0 : i32, i32
  }
  func.func @transform_3(%arg0: i32) -> (i32, i32, i32) {
    %c0_i32 = arith.constant 0 : i32
    %c0_i32_0 = arith.constant 0 : i32
    %c0_i32_1 = arith.constant 0 : i32
    return %arg0, %c0_i32, %c0_i32_0 : i32, i32, i32
  }
}

module attributes {stable_mosaic.version = 11 : i64} {
  func.func @kernel(%arg0: i32, %arg1: memref<1x16x1152xbf16, #tpu.memory_space<vmem>>, %arg2: memref<1152x128xbf16, #tpu.memory_space<vmem>>, %arg3: memref<1x128xf32, #tpu.memory_space<vmem>>, %arg4: memref<1x16x128xbf16, #tpu.memory_space<vmem>>, %arg5: memref<1x16x128xbf16, #tpu.memory_space<vmem>>) attributes {dimension_semantics = [#tpu.dimension_semantics<parallel>], iteration_bounds = array<i64: 2>, scalar_prefetch = 0 : i64, scratch_operands = 0 : i64, tpu.core_type = #tpu.core_type<tc>, window_params = [{transform_indices = @transform_0, window_bounds = array<i64: 1, 16, 1152>}, {pipeline_mode = #tpu.pipeline_mode<synchronous>, transform_indices = @transform_1, window_bounds = array<i64: 1152, 128>}, {pipeline_mode = #tpu.pipeline_mode<synchronous>, transform_indices = @transform_2, window_bounds = array<i64: 1, 128>}, {transform_indices = @transform_3, window_bounds = array<i64: 1, 16, 128>}, {transform_indices = @transform_4, window_bounds = array<i64: 1, 16, 128>}]} {
    %c0 = arith.constant 0 : index
    %c0_0 = arith.constant 0 : index
    %c0_1 = arith.constant 0 : index
    %0 = vector.load %arg1[%c0, %c0_0, %c0_1] : memref<1x16x1152xbf16, #tpu.memory_space<vmem>>, vector<1x16x1152xbf16>
    %1 = vector.shape_cast %0 : vector<1x16x1152xbf16> to vector<16x1152xbf16>
    %c0_2 = arith.constant 0 : index
    %c0_3 = arith.constant 0 : index
    %2 = vector.load %arg2[%c0_2, %c0_3] : memref<1152x128xbf16, #tpu.memory_space<vmem>>, vector<1152x128xbf16>
    %cst = arith.constant dense<0.000000e+00> : vector<16x128xf32>
    %3 = tpu.matmul %1, %2, %cst {dimension_numbers = #tpu.dot_dimension_numbers<[1], [0], [0], [1], [0, 0, 1, 1], [], []>} : vector<16x1152xbf16>, vector<1152x128xbf16>, vector<16x128xf32> -> vector<16x128xf32>
    %c0_4 = arith.constant 0 : index
    %c0_5 = arith.constant 0 : index
    %4 = vector.load %arg3[%c0_4, %c0_5] : memref<1x128xf32, #tpu.memory_space<vmem>>, vector<1x128xf32>
    %c0_6 = arith.constant 0 : index
    %c0_7 = arith.constant 0 : index
    %c0_8 = arith.constant 0 : index
    %5 = vector.load %arg4[%c0_6, %c0_7, %c0_8] : memref<1x16x128xbf16, #tpu.memory_space<vmem>>, vector<1x16x128xbf16>
    %6 = vector.shape_cast %5 : vector<1x16x128xbf16> to vector<16x128xbf16>
    %7 = vector.broadcast %4 : vector<1x128xf32> to vector<16x128xf32>
    %8 = arith.addf %3, %7 : vector<16x128xf32>
    %9 = arith.extf %6 : vector<16x128xbf16> to vector<16x128xf32>
    %10 = arith.addf %8, %9 : vector<16x128xf32>
    %cst_9 = arith.constant 0.000000e+00 : f32
    %11 = vector.broadcast %cst_9 : f32 to vector<16x128xf32>
    %12 = arith.maximumf %10, %11 : vector<16x128xf32>
    %13 = arith.truncf %12 : vector<16x128xf32> to vector<16x128xbf16>
    %c0_10 = arith.constant 0 : index
    %c0_11 = arith.constant 0 : index
    %c0_12 = arith.constant 0 : index
    %14 = vector.load %arg5[%c0_10, %c0_11, %c0_12] : memref<1x16x128xbf16, #tpu.memory_space<vmem>>, vector<1x16x128xbf16>
    %15 = vector.shape_cast %14 : vector<1x16x128xbf16> to vector<16x128xbf16>
    %16 = vector.shape_cast %13 : vector<16x128xbf16> to vector<1x16x128xbf16>
    tpu.vector_store %arg5[%c0_10, %c0_11, %c0_12], %16 {strides = array<i32>} : memref<1x16x128xbf16, #tpu.memory_space<vmem>>, vector<1x16x128xbf16>,
    return
  }
  func.func @transform_0(%arg0: i32) -> (i32, i32, i32) {
    %c0_i32 = arith.constant 0 : i32
    %c0_i32_0 = arith.constant 0 : i32
    %c0_i32_1 = arith.constant 0 : i32
    return %arg0, %c0_i32, %c0_i32_0 : i32, i32, i32
  }
  func.func @transform_1(%arg0: i32) -> (i32, i32) {
    %c0_i32 = arith.constant 0 : i32
    %c0_i32_0 = arith.constant 0 : i32
    %c0_i32_1 = arith.constant 0 : i32
    return %c0_i32, %c0_i32_0 : i32, i32
  }
  func.func @transform_2(%arg0: i32) -> (i32, i32) {
    %c0_i32 = arith.constant 0 : i32
    %c0_i32_0 = arith.constant 0 : i32
    %c0_i32_1 = arith.constant 0 : i32
    return %c0_i32, %c0_i32_0 : i32, i32
  }
  func.func @transform_3(%arg0: i32) -> (i32, i32, i32) {
    %c0_i32 = arith.constant 0 : i32
    %c0_i32_0 = arith.constant 0 : i32
    %c0_i32_1 = arith.constant 0 : i32
    return %arg0, %c0_i32, %c0_i32_0 : i32, i32, i32
  }
  func.func @transform_4(%arg0: i32) -> (i32, i32, i32) {
    %c0_i32 = arith.constant 0 : i32
    %c0_i32_0 = arith.constant 0 : i32
    %c0_i32_1 = arith.constant 0 : i32
    return %arg0, %c0_i32, %c0_i32_0 : i32, i32, i32
  }
}

module attributes {stable_mosaic.version = 11 : i64} {
  func.func @kernel(%arg0: i32, %arg1: memref<1x16x1152xbf16, #tpu.memory_space<vmem>>, %arg2: memref<1152x128xbf16, #tpu.memory_space<vmem>>, %arg3: memref<1x128xf32, #tpu.memory_space<vmem>>, %arg4: memref<1x16x128xbf16, #tpu.memory_space<vmem>>) attributes {dimension_semantics = [#tpu.dimension_semantics<parallel>], iteration_bounds = array<i64: 2>, scalar_prefetch = 0 : i64, scratch_operands = 0 : i64, tpu.core_type = #tpu.core_type<tc>, window_params = [{transform_indices = @transform_0, window_bounds = array<i64: 1, 16, 1152>}, {pipeline_mode = #tpu.pipeline_mode<synchronous>, transform_indices = @transform_1, window_bounds = array<i64: 1152, 128>}, {pipeline_mode = #tpu.pipeline_mode<synchronous>, transform_indices = @transform_2, window_bounds = array<i64: 1, 128>}, {transform_indices = @transform_3, window_bounds = array<i64: 1, 16, 128>}]} {
    %c0 = arith.constant 0 : index
    %c0_0 = arith.constant 0 : index
    %c0_1 = arith.constant 0 : index
    %0 = vector.load %arg1[%c0, %c0_0, %c0_1] : memref<1x16x1152xbf16, #tpu.memory_space<vmem>>, vector<1x16x1152xbf16>
    %1 = vector.shape_cast %0 : vector<1x16x1152xbf16> to vector<16x1152xbf16>
    %c0_2 = arith.constant 0 : index
    %c0_3 = arith.constant 0 : index
    %2 = vector.load %arg2[%c0_2, %c0_3] : memref<1152x128xbf16, #tpu.memory_space<vmem>>, vector<1152x128xbf16>
    %cst = arith.constant dense<0.000000e+00> : vector<16x128xf32>
    %3 = tpu.matmul %1, %2, %cst {dimension_numbers = #tpu.dot_dimension_numbers<[1], [0], [0], [1], [0, 0, 1, 1], [], []>} : vector<16x1152xbf16>, vector<1152x128xbf16>, vector<16x128xf32> -> vector<16x128xf32>
    %c0_4 = arith.constant 0 : index
    %c0_5 = arith.constant 0 : index
    %4 = vector.load %arg3[%c0_4, %c0_5] : memref<1x128xf32, #tpu.memory_space<vmem>>, vector<1x128xf32>
    %5 = vector.broadcast %4 : vector<1x128xf32> to vector<16x128xf32>
    %6 = arith.addf %3, %5 : vector<16x128xf32>
    %cst_6 = arith.constant 0.000000e+00 : f32
    %7 = vector.broadcast %cst_6 : f32 to vector<16x128xf32>
    %8 = arith.maximumf %6, %7 : vector<16x128xf32>
    %9 = arith.truncf %8 : vector<16x128xf32> to vector<16x128xbf16>
    %c0_7 = arith.constant 0 : index
    %c0_8 = arith.constant 0 : index
    %c0_9 = arith.constant 0 : index
    %10 = vector.load %arg4[%c0_7, %c0_8, %c0_9] : memref<1x16x128xbf16, #tpu.memory_space<vmem>>, vector<1x16x128xbf16>
    %11 = vector.shape_cast %10 : vector<1x16x128xbf16> to vector<16x128xbf16>
    %12 = vector.shape_cast %9 : vector<16x128xbf16> to vector<1x16x128xbf16>
    tpu.vector_store %arg4[%c0_7, %c0_8, %c0_9], %12 {strides = array<i32>} : memref<1x16x128xbf16, #tpu.memory_space<vmem>>, vector<1x16x128xbf16>,
    return
  }
  func.func @transform_0(%arg0: i32) -> (i32, i32, i32) {
    %c0_i32 = arith.constant 0 : i32
    %c0_i32_0 = arith.constant 0 : i32
    %c0_i32_1 = arith.constant 0 : i32
    return %arg0, %c0_i32, %c0_i32_0 : i32, i32, i32
  }
  func.func @transform_1(%arg0: i32) -> (i32, i32) {
    %c0_i32 = arith.constant 0 : i32
    %c0_i32_0 = arith.constant 0 : i32
    %c0_i32_1 = arith.constant 0 : i32
    return %c0_i32, %c0_i32_0 : i32, i32
  }
  func.func @transform_2(%arg0: i32) -> (i32, i32) {
    %c0_i32 = arith.constant 0 : i32
    %c0_i32_0 = arith.constant 0 : i32
    %c0_i32_1 = arith.constant 0 : i32
    return %c0_i32, %c0_i32_0 : i32, i32
  }
  func.func @transform_3(%arg0: i32) -> (i32, i32, i32) {
    %c0_i32 = arith.constant 0 : i32
    %c0_i32_0 = arith.constant 0 : i32
    %c0_i32_1 = arith.constant 0 : i32
    return %arg0, %c0_i32, %c0_i32_0 : i32, i32, i32
  }
}

module attributes {stable_mosaic.version = 11 : i64} {
  func.func @kernel(%arg0: i32, %arg1: memref<1x16x1152xbf16, #tpu.memory_space<vmem>>, %arg2: memref<1152x128xbf16, #tpu.memory_space<vmem>>, %arg3: memref<1x128xf32, #tpu.memory_space<vmem>>, %arg4: memref<1x16x128xbf16, #tpu.memory_space<vmem>>, %arg5: memref<1x8x128xf32, #tpu.memory_space<vmem>>) attributes {dimension_semantics = [#tpu.dimension_semantics<parallel>], iteration_bounds = array<i64: 2>, scalar_prefetch = 0 : i64, scratch_operands = 0 : i64, tpu.core_type = #tpu.core_type<tc>, window_params = [{transform_indices = @transform_0, window_bounds = array<i64: 1, 16, 1152>}, {pipeline_mode = #tpu.pipeline_mode<synchronous>, transform_indices = @transform_1, window_bounds = array<i64: 1152, 128>}, {pipeline_mode = #tpu.pipeline_mode<synchronous>, transform_indices = @transform_2, window_bounds = array<i64: 1, 128>}, {transform_indices = @transform_3, window_bounds = array<i64: 1, 16, 128>}, {transform_indices = @transform_4, window_bounds = array<i64: 1, 8, 128>}]} {
    %c0 = arith.constant 0 : index
    %c0_0 = arith.constant 0 : index
    %c0_1 = arith.constant 0 : index
    %0 = vector.load %arg1[%c0, %c0_0, %c0_1] : memref<1x16x1152xbf16, #tpu.memory_space<vmem>>, vector<1x16x1152xbf16>
    %1 = vector.shape_cast %0 : vector<1x16x1152xbf16> to vector<16x1152xbf16>
    %c0_2 = arith.constant 0 : index
    %c0_3 = arith.constant 0 : index
    %2 = vector.load %arg2[%c0_2, %c0_3] : memref<1152x128xbf16, #tpu.memory_space<vmem>>, vector<1152x128xbf16>
    %cst = arith.constant dense<0.000000e+00> : vector<16x128xf32>
    %3 = tpu.matmul %1, %2, %cst {dimension_numbers = #tpu.dot_dimension_numbers<[1], [0], [0], [1], [0, 0, 1, 1], [], []>} : vector<16x1152xbf16>, vector<1152x128xbf16>, vector<16x128xf32> -> vector<16x128xf32>
    %c0_4 = arith.constant 0 : index
    %c0_5 = arith.constant 0 : index
    %4 = vector.load %arg3[%c0_4, %c0_5] : memref<1x128xf32, #tpu.memory_space<vmem>>, vector<1x128xf32>
    %c0_6 = arith.constant 0 : index
    %c0_7 = arith.constant 0 : index
    %c0_8 = arith.constant 0 : index
    %5 = vector.load %arg4[%c0_6, %c0_7, %c0_8] : memref<1x16x128xbf16, #tpu.memory_space<vmem>>, vector<1x16x128xbf16>
    %6 = vector.shape_cast %5 : vector<1x16x128xbf16> to vector<16x128xbf16>
    %7 = vector.broadcast %4 : vector<1x128xf32> to vector<16x128xf32>
    %8 = arith.addf %3, %7 : vector<16x128xf32>
    %9 = arith.extf %6 : vector<16x128xbf16> to vector<16x128xf32>
    %10 = arith.addf %8, %9 : vector<16x128xf32>
    %cst_9 = arith.constant 0.000000e+00 : f32
    %11 = vector.broadcast %cst_9 : f32 to vector<16x128xf32>
    %12 = arith.maximumf %10, %11 : vector<16x128xf32>
    %cst_10 = arith.constant dense<0.000000e+00> : vector<128xf32>
    %13 = vector.multi_reduction <add>, %12, %cst_10 [0] : vector<16x128xf32> to vector<128xf32>
    %14 = vector.shape_cast %13 : vector<128xf32> to vector<1x128xf32>
    %cst_11 = arith.constant 1.600000e+01 : f32
    %15 = vector.broadcast %cst_11 : f32 to vector<1x128xf32>
    %16 = arith.divf %14, %15 : vector<1x128xf32>
    %17 = vector.shape_cast %16 : vector<1x128xf32> to vector<1x128xf32>
    %18 = vector.broadcast %17 : vector<1x128xf32> to vector<8x128xf32>
    %c0_12 = arith.constant 0 : index
    %c0_13 = arith.constant 0 : index
    %c0_14 = arith.constant 0 : index
    %19 = vector.load %arg5[%c0_12, %c0_13, %c0_14] : memref<1x8x128xf32, #tpu.memory_space<vmem>>, vector<1x8x128xf32>
    %20 = vector.shape_cast %19 : vector<1x8x128xf32> to vector<8x128xf32>
    %21 = vector.shape_cast %18 : vector<8x128xf32> to vector<1x8x128xf32>
    tpu.vector_store %arg5[%c0_12, %c0_13, %c0_14], %21 {strides = array<i32>} : memref<1x8x128xf32, #tpu.memory_space<vmem>>, vector<1x8x128xf32>,
    return
  }
  func.func @transform_0(%arg0: i32) -> (i32, i32, i32) {
    %c0_i32 = arith.constant 0 : i32
    %c0_i32_0 = arith.constant 0 : i32
    %c0_i32_1 = arith.constant 0 : i32
    return %arg0, %c0_i32, %c0_i32_0 : i32, i32, i32
  }
  func.func @transform_1(%arg0: i32) -> (i32, i32) {
    %c0_i32 = arith.constant 0 : i32
    %c0_i32_0 = arith.constant 0 : i32
    %c0_i32_1 = arith.constant 0 : i32
    return %c0_i32, %c0_i32_0 : i32, i32
  }
  func.func @transform_2(%arg0: i32) -> (i32, i32) {
    %c0_i32 = arith.constant 0 : i32
    %c0_i32_0 = arith.constant 0 : i32
    %c0_i32_1 = arith.constant 0 : i32
    return %c0_i32, %c0_i32_0 : i32, i32
  }
  func.func @transform_3(%arg0: i32) -> (i32, i32, i32) {
    %c0_i32 = arith.constant 0 : i32
    %c0_i32_0 = arith.constant 0 : i32
    %c0_i32_1 = arith.constant 0 : i32
    return %arg0, %c0_i32, %c0_i32_0 : i32, i32, i32
  }
  func.func @transform_4(%arg0: i32) -> (i32, i32, i32) {
    %c0_i32 = arith.constant 0 : i32
    %c0_i32_0 = arith.constant 0 : i32
    %c0_i32_1 = arith.constant 0 : i32
    return %arg0, %c0_i32, %c0_i32_0 : i32, i32, i32
  }
}

</mosaic_0001>

<bundles_post_ra>
// kernel: specialized_resnet_imagenet_forward.6
= control target key start
LH: loop header
LB: loop body
LE: loop exit
PB: predicated region body
PF: predicated region fallthrough
CT: control target
= control target key end

     0   :  { %s373_s12 = smov 0   ;;  %s405_s0 = inlined_call_operand.vmem [shape: bf16[2,16,64], index: 0, kind: input, shape index: {}]   ;;  %s406_s1 = inlined_call_operand.vmem [shape: bf16[64,128], index: 1, kind: input, shape index: {}]   ;;  %s407_s2 = inlined_call_operand.vmem [shape: f32[1,128], index: 2, kind: input, shape index: {}]   ;;  %s408_s3 = inlined_call_operand.vmem [shape: bf16[2,16,128], index: 3, kind: output, shape index: {}]  }
   0x1 LB: > { %s292_s13 = sadd.s32 4294967295, %s351_s12   ;;  %p296_p0 = scmp.ge.s32.totalorder %s351_s12, 1  ;;  %s351_s12 = sphi %s373_s12, %s13_s12  }
   0x2   : > { %p137_p1 = scmp.lt.s32.totalorder %s351_s12, 3 }
   0x4   : > { %p138_p2 = pnand %p296_p0, %p137_p1 }
   0x5   : > { %p161_p3 = scmp.lt.s32.totalorder (!%p138_p2), %s292_s13, 1 }
   0x6   : > { %141 = sbr.rel (%p138_p2) target bundleno = 166 (0xa6), region = 32 }
   0xb   : > { %v330_v0 = vld [vmem:[%s406_s1 + $0x18] sm:$0xff]  ;;  %v329_v1 = vld [vmem:[%s406_s1 + $0x10] sm:$0xff]  ;;  %s410_s13 = smov (!%p161_p3, %s292_s13), 1  ;;  %v328_v2 = vld [vmem:[%s406_s1 + $0x8] sm:$0xff]  ;;  %vm215_vm0 = vcmask 523264  }
   0xc   : > { %223 = vmatpush.bf16.msra.mxu0 %v330_v0  ;;  %s324_s20 = sshll.u32 %s410_s13, 3  ;;  %v327_v3 = vld [vmem:[%s406_s1] sm:$0xff] }
   0xd   : > { %s165_s25 = scalar_lea.vmem %s405_s0, %s324_s20  ;;  %v344_v6 = vld [vmem:[%s407_s2] ss:$0 sm:$0xff]  ;;  %s170_s30 = scalar_lea.vmem %s408_s3, %s324_s20 }
   0xe   : > { %v326_v4 = vld [vmem:[%s165_s25] sm:$0xff] }
  0x10   : > { %224 = vmatpush.bf16.msra.mxu0 %v329_v1 }
  0x14   : > { %225 = vmatpush.bf16.msra.mxu0 %v328_v2 }
  0x18   : > { %226 = vmatpush.bf16.msra.mxu0 %v327_v3 }
  0x1b   : > { %321 = vmatmul.msk.bf16.vlgmr.msra.gmra.mxu0 %vm215_vm0, %v326_v4 }
  0x98   : > { %v228_v5 = vpop.f32.mrf.mxu0 }
  0x99   : > { %v229_v8 = vadd.f32 %v344_v6, %v228_v5 }
  0xa0   : > { %v230_v7 = vpop.f32.mrf.mxu0 }
  0xa1   : > { %v231_v9 = vadd.f32 %v344_v6, %v230_v7 }
  0xa3   : > { %v334_v10 = vpack.c.bf16 %v231_v9, %v229_v8 }
  0xa5   : > { %335 = vst [vmem:[%s170_s30] sm:$0xff] %v334_v10  }
  0xa6 PF: > { %s13_s12 = sadd.s32 1, %s351_s12  }
  0xa7   : > { %p10_p4 = scmp.ge.s32.totalorder %s13_s12, 4  }
  0xa9   :  { %12 = sbr.rel (!%p10_p4) target bundleno = 1 (0x1), region = 62 }

// kernel: specialized_resnet_imagenet_forward.5
= control target key start
LH: loop header
LB: loop body
LE: loop exit
PB: predicated region body
PF: predicated region fallthrough
CT: control target
= control target key end

     0   :  { %s890_s12 = smov 0   ;;  %s1038_s0 = inlined_call_operand.vmem [shape: bf16[2,16,576], index: 0, kind: input, shape index: {}]   ;;  %s1039_s1 = inlined_call_operand.vmem [shape: bf16[576,128], index: 1, kind: input, shape index: {}]   ;;  %s1040_s2 = inlined_call_operand.vmem [shape: f32[1,128], index: 2, kind: input, shape index: {}]   ;;  %s1041_s3 = inlined_call_operand.vmem [shape: bf16[2,16,128], index: 3, kind: output, shape index: {}]  }
   0x1 LB: > { %s630_s13 = sadd.s32 4294967295, %s868_s12   ;;  %p634_p0 = scmp.ge.s32.totalorder %s868_s12, 1  ;;  %s868_s12 = sphi %s890_s12, %s13_s12  }
   0x2   : > { %p137_p1 = scmp.lt.s32.totalorder %s868_s12, 3 }
   0x4   : > { %p138_p2 = pnand %p634_p0, %p137_p1 }
   0x5   : > { %p161_p3 = scmp.lt.s32.totalorder (!%p138_p2), %s630_s13, 1 }
   0x6   : > { %141 = sbr.rel (%p138_p2) target bundleno = 200 (0xc8), region = 32 }
   0xb   : > { %v818_v0 = vld [vmem:[%s1039_s1 + $0x38] sm:$0xff]  ;;  %v817_v4 = vld [vmem:[%s1039_s1 + $0x30] sm:$0xff]  ;;  %v816_v8 = vld [vmem:[%s1039_s1 + $0x28] sm:$0xff]  ;;  %s1043_s13 = smov (!%p161_p3, %s630_s13), 1  ;;  %vm495_vm0 = vcmask 523264  }
   0xc   : > { %v834_v1 = vld [vmem:[%s1039_s1 + $0xb8] sm:$0xff]  ;;  %499 = vmatpush.bf16.msra.mxu0 %v818_v0  ;;  %v833_v5 = vld [vmem:[%s1039_s1 + $0xb0] sm:$0xff]  ;;  %v832_v9 = vld [vmem:[%s1039_s1 + $0xa8] sm:$0xff]  ;;  %s852_s6 = smul.u32 40, %s1043_s13  ;;  %s805_s17 = sshll.u32 %s1043_s13, 3 }
   0xd   : > { %v842_v2 = vld [vmem:[%s1039_s1 + $0xf8] sm:$0xff]  ;;  %527 = vmatpush.bf16.msra.mxu2 %v834_v1  ;;  %v841_v6 = vld [vmem:[%s1039_s1 + $0xf0] sm:$0xff]  ;;  %v840_v10 = vld [vmem:[%s1039_s1 + $0xe8] sm:$0xff]  ;;  %s170_s20 = scalar_lea.vmem %s1041_s3, %s805_s17 }
   0xe   : > { %v826_v3 = vld [vmem:[%s1039_s1 + $0x78] sm:$0xff]  ;;  %541 = vmatpush.bf16.msra.mxu3 %v842_v2  ;;  %v825_v7 = vld [vmem:[%s1039_s1 + $0x70] sm:$0xff]  ;;  %v824_v11 = vld [vmem:[%s1039_s1 + $0x68] sm:$0xff]  ;;  %s986_s19 = scalar_lea.vmem %s1038_s0, %s852_s6 }
   0xf   : > { %513 = vmatpush.bf16.msra.mxu1 %v826_v3  ;;  %v815_v12 = vld [vmem:[%s1039_s1 + $0x20] sm:$0xff]  ;;  %v814_v16 = vld [vmem:[%s1039_s1 + $0x18] sm:$0xff]  ;;  %v813_v20 = vld [vmem:[%s1039_s1 + $0x10] sm:$0xff] }
  0x10   : > { %500 = vmatpush.bf16.msra.mxu0 %v817_v4  ;;  %v831_v13 = vld [vmem:[%s1039_s1 + $0xa0] sm:$0xff]  ;;  %v830_v17 = vld [vmem:[%s1039_s1 + $0x98] sm:$0xff]  ;;  %v829_v21 = vld [vmem:[%s1039_s1 + $0x90] sm:$0xff] }
  0x11   : > { %528 = vmatpush.bf16.msra.mxu2 %v833_v5  ;;  %v839_v14 = vld [vmem:[%s1039_s1 + $0xe0] sm:$0xff]  ;;  %v838_v18 = vld [vmem:[%s1039_s1 + $0xd8] sm:$0xff]  ;;  %v837_v22 = vld [vmem:[%s1039_s1 + $0xd0] sm:$0xff] }
  0x12   : > { %542 = vmatpush.bf16.msra.mxu3 %v841_v6  ;;  %v823_v15 = vld [vmem:[%s1039_s1 + $0x60] sm:$0xff]  ;;  %v822_v19 = vld [vmem:[%s1039_s1 + $0x58] sm:$0xff]  ;;  %v821_v23 = vld [vmem:[%s1039_s1 + $0x50] sm:$0xff] }
  0x13   : > { %514 = vmatpush.bf16.msra.mxu1 %v825_v7  ;;  %v812_v24 = vld [vmem:[%s1039_s1 + $0x8] sm:$0xff]  ;;  %v811_v28 = vld [vmem:[%s1039_s1] sm:$0xff]  ;;  %v808_v33 = vld [vmem:[%s986_s19 + $0x10] sm:$0xf0] }
  0x14   : > { %501 = vmatpush.bf16.msra.mxu0 %v816_v8  ;;  %v828_v25 = vld [vmem:[%s1039_s1 + $0x88] sm:$0xff]  ;;  %v827_v29 = vld [vmem:[%s1039_s1 + $0x80] sm:$0xff]  ;;  %v809_v35 = vld [vmem:[%s986_s19 + $0x18] sm:$0xf0] }
  0x15   : > { %529 = vmatpush.bf16.msra.mxu2 %v832_v9  ;;  %v836_v26 = vld [vmem:[%s1039_s1 + $0xc8] sm:$0xff]  ;;  %v835_v30 = vld [vmem:[%s1039_s1 + $0xc0] sm:$0xff]  ;;  %v642_v39 = vld [vmem:[%s986_s19 + $0x14] sm:$0xf0] }
  0x16   : > { %543 = vmatpush.bf16.msra.mxu3 %v840_v10  ;;  %v820_v27 = vld [vmem:[%s1039_s1 + $0x48] sm:$0xff]  ;;  %v819_v31 = vld [vmem:[%s1039_s1 + $0x40] sm:$0xff]  ;;  %v846_v40 = vld [vmem:[%s1039_s1 + $0x118] sm:$0xff] }
  0x17   : > { %515 = vmatpush.bf16.msra.mxu1 %v824_v11  ;;  %v640_v32 = vld [vmem:[%s986_s19] sm:$0xf]  ;;  %v648_v34 = vld [vmem:[%s986_s19 + $0x8] sm:$0xf]  ;;  %v807_v36 = vld [vmem:[%s986_s19 + $0xc] sm:$0xf] }
  0x18   : > { %502 = vmatpush.bf16.msra.mxu0 %v815_v12  ;;  %v650_v37 = vld [vmem:[%s986_s19 + $0x1c] sm:$0xf0]  ;;  %v806_v38 = vld [vmem:[%s986_s19 + $0x4] sm:$0xf]  ;;  %v641_v41 = vor.u32 %v808_v33, %v640_v32  ;;  %v649_v42 = vor.u32 %v809_v35, %v648_v34  ;;  %v845_v45 = vld [vmem:[%s1039_s1 + $0x110] sm:$0xff] }
  0x19   : > { %530 = vmatpush.bf16.msra.mxu2 %v831_v13  ;;  %v653_v43 = vor.u32 %v807_v36, %v650_v37  ;;  %v645_v44 = vor.u32 %v806_v38, %v642_v39  ;;  %v844_v46 = vld [vmem:[%s1039_s1 + $0x108] sm:$0xff]  ;;  %v843_v47 = vld [vmem:[%s1039_s1 + $0x100] sm:$0xff]  ;;  %v656_v48 = vld [vmem:[%s986_s19 + $0x10] sm:$0xf] }
  0x1a   : > { %544 = vmatpush.bf16.msra.mxu3 %v839_v14  ;;  %v810_v49 = vld [vmem:[%s986_s19 + $0x20] sm:$0xf0]  ;;  %v861_v54 = vld [vmem:[%s1040_s2] ss:$0 sm:$0xff] }
  0x1b   : > { %516 = vmatpush.bf16.msra.mxu1 %v823_v15  ;;  %v657_v50 = vor.u32 %v810_v49, %v656_v48 }
  0x1c   : > { %503 = vmatpush.bf16.msra.mxu0 %v814_v16 }
  0x1d   : > { %531 = vmatpush.bf16.msra.mxu2 %v830_v17 }
  0x1e   : > { %545 = vmatpush.bf16.msra.mxu3 %v838_v18 }
  0x1f   : > { %517 = vmatpush.bf16.msra.mxu1 %v822_v19 }
  0x20   : > { %504 = vmatpush.bf16.msra.mxu0 %v813_v20 }
  0x21   : > { %532 = vmatpush.bf16.msra.mxu2 %v829_v21 }
  0x22   : > { %546 = vmatpush.bf16.msra.mxu3 %v837_v22 }
  0x23   : > { %518 = vmatpush.bf16.msra.mxu1 %v821_v23 }
  0x24   : > { %505 = vmatpush.bf16.msra.mxu0 %v812_v24 }
  0x25   : > { %533 = vmatpush.bf16.msra.mxu2 %v828_v25 }
  0x26   : > { %547 = vmatpush.bf16.msra.mxu3 %v836_v26 }
  0x27   : > { %519 = vmatpush.bf16.msra.mxu1 %v820_v27 }
  0x28   : > { %506 = vmatpush.bf16.msra.mxu0 %v811_v28 }
  0x29   : > { %534 = vmatpush.bf16.msra.mxu2 %v827_v29 }
  0x2a   : > { %548 = vmatpush.bf16.msra.mxu3 %v835_v30 }
  0x2b   : > { %520 = vmatpush.bf16.msra.mxu1 %v819_v31  ;;  %507 = vmatmul.bf16.vlgmr.msra.gmra.mxu0 %v641_v41 }
  0x2c   : > { %559 = vmatpush.bf16.msrb.mxu0 %v846_v40  ;;  %535 = vmatmul.bf16.vlgmr.msra.gmra.mxu2 %v649_v42 }
  0x2d   : > { %549 = vmatmul.bf16.vlgmr.msra.gmra.mxu3 %v653_v43 }
  0x2e   : > { %521 = vmatmul.bf16.vlgmr.msra.gmra.mxu1 %v645_v44 }
  0x30   : > { %560 = vmatpush.bf16.msrb.mxu0 %v845_v45 }
  0x34   : > { %561 = vmatpush.bf16.msrb.mxu0 %v844_v46 }
  0x38   : > { %562 = vmatpush.bf16.msrb.mxu0 %v843_v47 }
  0x3b   : > { %802 = vmatmul.msk.bf16.vlgmr.msrb.gmra.mxu0 %vm495_vm0, %v657_v50 }
  0xa8   : > { %v508_v51 = vpop.f32.mrf.mxu0 }
  0xa9   : > { %v509_v56 = vadd.f32 %v861_v54, %v508_v51 }
  0xab   : > { %v522_v52 = vpop.f32.mrf.mxu1 }
  0xac   : > { %v523_v60 = vadd.f32 %v522_v52, %v509_v56 }
  0xaf   : > { %v536_v53 = vpop.f32.mrf.mxu2 }
  0xb0   : > { %v510_v55 = vpop.f32.mrf.mxu0  ;;  %v550_v57 = vpop.f32.mrf.mxu3  ;;  %v537_v63 = vadd.f32 %v536_v53, %v523_v60 }
  0xb1   : > { %v511_v58 = vadd.f32 %v861_v54, %v510_v55 }
  0xb2   : > { %v551_v2 = vadd.f32 %v550_v57, %v537_v63 }
  0xb3   : > { %v524_v59 = vpop.f32.mrf.mxu1 }
  0xb4   : > { %v525_v0 = vadd.f32 %v524_v59, %v511_v58 }
  0xb7   : > { %v538_v61 = vpop.f32.mrf.mxu2 }
  0xb8   : > { %v564_v62 = vpop.f32.mrf.mxu0  ;;  %v539_v1 = vadd.f32 %v538_v61, %v525_v0  ;;  %v552_v3 = vpop.f32.mrf.mxu3 }
  0xb9   : > { %v565_v5 = vadd.f32 %v564_v62, %v551_v2 }
  0xba   : > { %v553_v4 = vadd.f32 %v552_v3, %v539_v1 }
  0xbb   : > { %v569_v8 = vmax.f32 %v565_v5, 0.0 }
  0xc0   : > { %v566_v6 = vpop.f32.mrf.mxu0 }
  0xc1   : > { %v567_v7 = vadd.f32 %v566_v6, %v553_v4 }
  0xc3   : > { %v570_v9 = vmax.f32 %v567_v7, 0.0 }
  0xc5   : > { %v850_v10 = vpack.c.bf16 %v570_v9, %v569_v8 }
  0xc7   : > { %851 = vst [vmem:[%s170_s20] sm:$0xff] %v850_v10  }
  0xc8 PF: > { %s13_s12 = sadd.s32 1, %s868_s12  }
  0xc9   : > { %p10_p4 = scmp.ge.s32.totalorder %s13_s12, 4  }
  0xcb   :  { %12 = sbr.rel (!%p10_p4) target bundleno = 1 (0x1), region = 62 }

// kernel: specialized_resnet_imagenet_forward.7
= control target key start
LH: loop header
LB: loop body
LE: loop exit
PB: predicated region body
PF: predicated region fallthrough
CT: control target
= control target key end

     0   :  { %s1530_s15 = smov 0   ;;  %s1797_s0 = inlined_call_operand.vmem [shape: bf16[2,16,1152], index: 0, kind: input, shape index: {}]   ;;  %s1798_s1 = inlined_call_operand.vmem [shape: bf16[1152,128], index: 1, kind: input, shape index: {}]   ;;  %s1799_s2 = inlined_call_operand.vmem [shape: f32[1,128], index: 2, kind: input, shape index: {}]   ;;  %s1800_s3 = inlined_call_operand.vmem [shape: bf16[2,16,128], index: 3, kind: input, shape index: {}]   ;;  %s1801_s4 = inlined_call_operand.vmem [shape: bf16[2,16,128], index: 4, kind: output, shape index: {}]  }
   0x1 LB: > { %s1059_s16 = sadd.s32 4294967295, %s1503_s15   ;;  %p1063_p0 = scmp.ge.s32.totalorder %s1503_s15, 1  ;;  %s1503_s15 = sphi %s1530_s15, %s14_s15  }
   0x2   : > { %p172_p1 = scmp.lt.s32.totalorder %s1503_s15, 3 }
   0x4   : > { %p173_p2 = pnand %p1063_p0, %p172_p1 }
   0x5   : > { %p203_p3 = scmp.lt.s32.totalorder (!%p173_p2), %s1059_s16, 1 }
   0x6   : > { %176 = sbr.rel (%p173_p2) target bundleno = 250 (0xfa), region = 36 }
   0xb   : > { %v1413_v0 = vld [vmem:[%s1798_s1 + $0x38] sm:$0xff]  ;;  %v1412_v4 = vld [vmem:[%s1798_s1 + $0x30] sm:$0xff]  ;;  %v1411_v8 = vld [vmem:[%s1798_s1 + $0x28] sm:$0xff]  ;;  %s1803_s16 = smov (!%p203_p3, %s1059_s16), 1 }
   0xc   : > { %v1429_v1 = vld [vmem:[%s1798_s1 + $0xb8] sm:$0xff]  ;;  %856 = vmatpush.bf16.msra.mxu0 %v1413_v0  ;;  %v1428_v5 = vld [vmem:[%s1798_s1 + $0xb0] sm:$0xff]  ;;  %v1427_v9 = vld [vmem:[%s1798_s1 + $0xa8] sm:$0xff]  ;;  %s1487_s17 = smul.u32 72, %s1803_s16 }
   0xd   : > { %v1421_v2 = vld [vmem:[%s1798_s1 + $0x78] sm:$0xff]  ;;  %884 = vmatpush.bf16.msra.mxu2 %v1429_v1  ;;  %v1420_v6 = vld [vmem:[%s1798_s1 + $0x70] sm:$0xff]  ;;  %v1419_v10 = vld [vmem:[%s1798_s1 + $0x68] sm:$0xff] }
   0xe   : > { %v1437_v3 = vld [vmem:[%s1798_s1 + $0xf8] sm:$0xff]  ;;  %870 = vmatpush.bf16.msra.mxu1 %v1421_v2  ;;  %v1436_v7 = vld [vmem:[%s1798_s1 + $0xf0] sm:$0xff]  ;;  %v1435_v11 = vld [vmem:[%s1798_s1 + $0xe8] sm:$0xff]  ;;  %s1632_s28 = scalar_lea.vmem %s1797_s0, %s1487_s17 }
   0xf   : > { %898 = vmatpush.bf16.msra.mxu3 %v1437_v3  ;;  %v1410_v12 = vld [vmem:[%s1798_s1 + $0x20] sm:$0xff]  ;;  %v1409_v16 = vld [vmem:[%s1798_s1 + $0x18] sm:$0xff]  ;;  %v1408_v20 = vld [vmem:[%s1798_s1 + $0x10] sm:$0xff] }
  0x10   : > { %857 = vmatpush.bf16.msra.mxu0 %v1412_v4  ;;  %v1426_v13 = vld [vmem:[%s1798_s1 + $0xa0] sm:$0xff]  ;;  %v1425_v17 = vld [vmem:[%s1798_s1 + $0x98] sm:$0xff]  ;;  %v1424_v21 = vld [vmem:[%s1798_s1 + $0x90] sm:$0xff] }
  0x11   : > { %885 = vmatpush.bf16.msra.mxu2 %v1428_v5  ;;  %v1418_v14 = vld [vmem:[%s1798_s1 + $0x60] sm:$0xff]  ;;  %v1417_v18 = vld [vmem:[%s1798_s1 + $0x58] sm:$0xff]  ;;  %v1416_v22 = vld [vmem:[%s1798_s1 + $0x50] sm:$0xff] }
  0x12   : > { %871 = vmatpush.bf16.msra.mxu1 %v1420_v6  ;;  %v1434_v15 = vld [vmem:[%s1798_s1 + $0xe0] sm:$0xff]  ;;  %v1433_v19 = vld [vmem:[%s1798_s1 + $0xd8] sm:$0xff]  ;;  %v1432_v23 = vld [vmem:[%s1798_s1 + $0xd0] sm:$0xff] }
  0x13   : > { %899 = vmatpush.bf16.msra.mxu3 %v1436_v7  ;;  %v1407_v24 = vld [vmem:[%s1798_s1 + $0x8] sm:$0xff]  ;;  %v1406_v28 = vld [vmem:[%s1798_s1] sm:$0xff]  ;;  %v1445_v30 = vld [vmem:[%s1798_s1 + $0x138] sm:$0xff] }
  0x14   : > { %858 = vmatpush.bf16.msra.mxu0 %v1411_v8  ;;  %v1423_v25 = vld [vmem:[%s1798_s1 + $0x88] sm:$0xff]  ;;  %v1422_v29 = vld [vmem:[%s1798_s1 + $0x80] sm:$0xff]  ;;  %v1461_v31 = vld [vmem:[%s1798_s1 + $0x1b8] sm:$0xff] }
  0x15   : > { %886 = vmatpush.bf16.msra.mxu2 %v1427_v9  ;;  %v1415_v26 = vld [vmem:[%s1798_s1 + $0x48] sm:$0xff]  ;;  %v1414_v32 = vld [vmem:[%s1798_s1 + $0x40] sm:$0xff]  ;;  %v1453_v38 = vld [vmem:[%s1798_s1 + $0x178] sm:$0xff] }
  0x16   : > { %872 = vmatpush.bf16.msra.mxu1 %v1419_v10  ;;  %v1431_v27 = vld [vmem:[%s1798_s1 + $0xc8] sm:$0xff]  ;;  %v1430_v33 = vld [vmem:[%s1798_s1 + $0xc0] sm:$0xff]  ;;  %v1469_v39 = vld [vmem:[%s1798_s1 + $0x1f8] sm:$0xff] }
  0x17   : > { %900 = vmatpush.bf16.msra.mxu3 %v1435_v11  ;;  %v1071_v34 = vld [vmem:[%s1632_s28] sm:$0xf]  ;;  %v1401_v35 = vld [vmem:[%s1632_s28 + $0x20] sm:$0xf0]  ;;  %v1079_v36 = vld [vmem:[%s1632_s28 + $0x8] sm:$0xf] }
  0x18   : > { %859 = vmatpush.bf16.msra.mxu0 %v1410_v12  ;;  %v1402_v37 = vld [vmem:[%s1632_s28 + $0x28] sm:$0xf0]  ;;  %v1397_v40 = vld [vmem:[%s1632_s28 + $0x4] sm:$0xf]  ;;  %v1073_v41 = vld [vmem:[%s1632_s28 + $0x24] sm:$0xf0]  ;;  %v1072_v44 = vor.u32 %v1401_v35, %v1071_v34 }
  0x19   : > { %887 = vmatpush.bf16.msra.mxu2 %v1426_v13  ;;  %v1398_v42 = vld [vmem:[%s1632_s28 + $0xc] sm:$0xf]  ;;  %v1081_v43 = vld [vmem:[%s1632_s28 + $0x2c] sm:$0xf0]  ;;  %v1080_v45 = vor.u32 %v1402_v37, %v1079_v36  ;;  %v1076_v48 = vor.u32 %v1397_v40, %v1073_v41  ;;  %v1442_v56 = vld [vmem:[%s1798_s1 + $0x120] sm:$0xff] }
  0x1a   : > { %873 = vmatpush.bf16.msra.mxu1 %v1418_v14  ;;  %v1444_v46 = vld [vmem:[%s1798_s1 + $0x130] sm:$0xff]  ;;  %v1084_v49 = vor.u32 %v1398_v42, %v1081_v43  ;;  %v1443_v52 = vld [vmem:[%s1798_s1 + $0x128] sm:$0xff]  ;;  %v1458_v57 = vld [vmem:[%s1798_s1 + $0x1a0] sm:$0xff] }
  0x1b   : > { %901 = vmatpush.bf16.msra.mxu3 %v1434_v15  ;;  %v1460_v47 = vld [vmem:[%s1798_s1 + $0x1b0] sm:$0xff]  ;;  %v1459_v53 = vld [vmem:[%s1798_s1 + $0x1a8] sm:$0xff]  ;;  %v1450_v58 = vld [vmem:[%s1798_s1 + $0x160] sm:$0xff] }
  0x1c   : > { %860 = vmatpush.bf16.msra.mxu0 %v1409_v16  ;;  %v1452_v50 = vld [vmem:[%s1798_s1 + $0x170] sm:$0xff]  ;;  %v1451_v54 = vld [vmem:[%s1798_s1 + $0x168] sm:$0xff]  ;;  %v1466_v59 = vld [vmem:[%s1798_s1 + $0x1e0] sm:$0xff] }
  0x1d   : > { %888 = vmatpush.bf16.msra.mxu2 %v1425_v17  ;;  %v1468_v51 = vld [vmem:[%s1798_s1 + $0x1f0] sm:$0xff]  ;;  %v1467_v55 = vld [vmem:[%s1798_s1 + $0x1e8] sm:$0xff]  ;;  %v1441_v60 = vld [vmem:[%s1798_s1 + $0x118] sm:$0xff] }
  0x1e   : > { %874 = vmatpush.bf16.msra.mxu1 %v1417_v18  ;;  %v1457_v61 = vld [vmem:[%s1798_s1 + $0x198] sm:$0xff]  ;;  %v1440_v0 = vld [vmem:[%s1798_s1 + $0x110] sm:$0xff]  ;;  %v1439_v4 = vld [vmem:[%s1798_s1 + $0x108] sm:$0xff] }
  0x1f   : > { %902 = vmatpush.bf16.msra.mxu3 %v1433_v19  ;;  %v1449_v62 = vld [vmem:[%s1798_s1 + $0x158] sm:$0xff]  ;;  %v1456_v1 = vld [vmem:[%s1798_s1 + $0x190] sm:$0xff]  ;;  %v1455_v5 = vld [vmem:[%s1798_s1 + $0x188] sm:$0xff] }
  0x20   : > { %861 = vmatpush.bf16.msra.mxu0 %v1408_v20  ;;  %v1465_v63 = vld [vmem:[%s1798_s1 + $0x1d8] sm:$0xff]  ;;  %v1448_v2 = vld [vmem:[%s1798_s1 + $0x150] sm:$0xff]  ;;  %v1447_v6 = vld [vmem:[%s1798_s1 + $0x148] sm:$0xff] }
  0x21   : > { %889 = vmatpush.bf16.msra.mxu2 %v1424_v21  ;;  %v1464_v3 = vld [vmem:[%s1798_s1 + $0x1d0] sm:$0xff]  ;;  %v1463_v7 = vld [vmem:[%s1798_s1 + $0x1c8] sm:$0xff]  ;;  %v1438_v8 = vld [vmem:[%s1798_s1 + $0x100] sm:$0xff] }
  0x22   : > { %875 = vmatpush.bf16.msra.mxu1 %v1416_v22  ;;  %v1454_v9 = vld [vmem:[%s1798_s1 + $0x180] sm:$0xff]  ;;  %v1477_v10 = vld [vmem:[%s1798_s1 + $0x238] sm:$0xff]  ;;  %v1087_v11 = vld [vmem:[%s1632_s28 + $0x10] sm:$0xf] }
  0x23   : > { %903 = vmatpush.bf16.msra.mxu3 %v1432_v23  ;;  %v1403_v12 = vld [vmem:[%s1632_s28 + $0x30] sm:$0xf0]  ;;  %v1095_v13 = vld [vmem:[%s1632_s28 + $0x18] sm:$0xf]  ;;  %v1404_v14 = vld [vmem:[%s1632_s28 + $0x38] sm:$0xf0] }
  0x24   : > { %862 = vmatpush.bf16.msra.mxu0 %v1407_v24  ;;  %v1446_v15 = vld [vmem:[%s1798_s1 + $0x140] sm:$0xff]  ;;  %v1399_v17 = vld [vmem:[%s1632_s28 + $0x14] sm:$0xf]  ;;  %v1089_v18 = vld [vmem:[%s1632_s28 + $0x34] sm:$0xf0]  ;;  %v1088_v21 = vor.u32 %v1403_v12, %v1087_v11  ;;  %v1096_v22 = vor.u32 %v1404_v14, %v1095_v13 }
  0x25   : > { %890 = vmatpush.bf16.msra.mxu2 %v1423_v25  ;;  %v1462_v16 = vld [vmem:[%s1798_s1 + $0x1c0] sm:$0xff]  ;;  %v1400_v19 = vld [vmem:[%s1632_s28 + $0x1c] sm:$0xf]  ;;  %v1092_v23 = vor.u32 %v1399_v17, %v1089_v18  ;;  %v1476_v25 = vld [vmem:[%s1798_s1 + $0x230] sm:$0xff] }
  0x26   : > { %876 = vmatpush.bf16.msra.mxu1 %v1415_v26  ;;  %v1097_v20 = vld [vmem:[%s1632_s28 + $0x3c] sm:$0xf0]  ;;  %v1475_v26 = vld [vmem:[%s1798_s1 + $0x228] sm:$0xff] }
  0x27   : > { %904 = vmatpush.bf16.msra.mxu3 %v1431_v27  ;;  %v1100_v24 = vor.u32 %v1400_v19, %v1097_v20  ;;  %v1474_v27 = vld [vmem:[%s1798_s1 + $0x220] sm:$0xff] }
  0x28   : > { %863 = vmatpush.bf16.msra.mxu0 %v1406_v28  ;;  %v1473_v28 = vld [vmem:[%s1798_s1 + $0x218] sm:$0xff] }
  0x29   : > { %891 = vmatpush.bf16.msra.mxu2 %v1422_v29  ;;  %v1472_v29 = vld [vmem:[%s1798_s1 + $0x210] sm:$0xff] }
  0x2a   : > { %877 = vmatpush.bf16.msra.mxu1 %v1414_v32  ;;  %v1103_v32 = vld [vmem:[%s1632_s28 + $0x20] sm:$0xf] }
  0x2b   : > { %905 = vmatpush.bf16.msra.mxu3 %v1430_v33  ;;  %864 = vmatmul.bf16.vlgmr.msra.gmra.mxu0 %v1072_v44  ;;  %v1405_v33 = vld [vmem:[%s1632_s28 + $0x40] sm:$0xf0]  ;;  %s1395_s28 = sshll.u32 %s1803_s16, 3 }
  0x2c   : > { %912 = vmatpush.bf16.msrb.mxu0 %v1445_v30  ;;  %892 = vmatmul.bf16.vlgmr.msra.gmra.mxu2 %v1080_v45  ;;  %v1471_v30 = vld [vmem:[%s1798_s1 + $0x208] sm:$0xff]  ;;  %v1104_v34 = vor.u32 %v1405_v33, %v1103_v32  ;;  %s212_s29 = scalar_lea.vmem %s1800_s3, %s1395_s28  ;;  %s217_s5 = scalar_lea.vmem %s1801_s4, %s1395_s28 }
  0x2d   : > { %940 = vmatpush.bf16.msrb.mxu2 %v1461_v31  ;;  %878 = vmatmul.bf16.vlgmr.msra.gmra.mxu1 %v1076_v48  ;;  %v1470_v31 = vld [vmem:[%s1798_s1 + $0x200] sm:$0xff] }
  0x2e   : > { %926 = vmatpush.bf16.msrb.mxu1 %v1453_v38  ;;  %906 = vmatmul.bf16.vlgmr.msra.gmra.mxu3 %v1084_v49  ;;  %v1496_v38 = vld [vmem:[%s1799_s2] ss:$0 sm:$0xff] }
  0x2f   : > { %954 = vmatpush.bf16.msrb.mxu3 %v1469_v39 }
  0x30   : > { %913 = vmatpush.bf16.msrb.mxu0 %v1444_v46 }
  0x31   : > { %941 = vmatpush.bf16.msrb.mxu2 %v1460_v47 }
  0x32   : > { %927 = vmatpush.bf16.msrb.mxu1 %v1452_v50 }
  0x33   : > { %955 = vmatpush.bf16.msrb.mxu3 %v1468_v51 }
  0x34   : > { %914 = vmatpush.bf16.msrb.mxu0 %v1443_v52 }
  0x35   : > { %942 = vmatpush.bf16.msrb.mxu2 %v1459_v53 }
  0x36   : > { %928 = vmatpush.bf16.msrb.mxu1 %v1451_v54 }
  0x37   : > { %956 = vmatpush.bf16.msrb.mxu3 %v1467_v55 }
  0x38   : > { %915 = vmatpush.bf16.msrb.mxu0 %v1442_v56 }
  0x39   : > { %943 = vmatpush.bf16.msrb.mxu2 %v1458_v57 }
  0x3a   : > { %929 = vmatpush.bf16.msrb.mxu1 %v1450_v58 }
  0x3b   : > { %957 = vmatpush.bf16.msrb.mxu3 %v1466_v59 }
  0x3c   : > { %916 = vmatpush.bf16.msrb.mxu0 %v1441_v60 }
  0x3d   : > { %944 = vmatpush.bf16.msrb.mxu2 %v1457_v61 }
  0x3e   : > { %930 = vmatpush.bf16.msrb.mxu1 %v1449_v62 }
  0x3f   : > { %958 = vmatpush.bf16.msrb.mxu3 %v1465_v63 }
  0x40   : > { %917 = vmatpush.bf16.msrb.mxu0 %v1440_v0 }
  0x41   : > { %945 = vmatpush.bf16.msrb.mxu2 %v1456_v1  ;;  %v1479_v1 = vld [vmem:[%s212_s29] sm:$0xff]  }
  0x42   : > { %931 = vmatpush.bf16.msrb.mxu1 %v1448_v2 }
  0x43   : > { %959 = vmatpush.bf16.msrb.mxu3 %v1464_v3 }
  0x44   : > { %918 = vmatpush.bf16.msrb.mxu0 %v1439_v4 }
  0x45   : > { %946 = vmatpush.bf16.msrb.mxu2 %v1455_v5  ;;  %v1480_v5 = vunpack.c.l.bf16 %v1479_v1 }
  0x46   : > { %932 = vmatpush.bf16.msrb.mxu1 %v1447_v6 }
  0x47   : > { %960 = vmatpush.bf16.msrb.mxu3 %v1463_v7 }
  0x48   : > { %919 = vmatpush.bf16.msrb.mxu0 %v1438_v8  ;;  %v1481_v8 = vunpack.c.h.bf16 %v1479_v1 }
  0x49   : > { %947 = vmatpush.bf16.msrb.mxu2 %v1454_v9 }
  0x4a   : > { %933 = vmatpush.bf16.msrb.mxu1 %v1446_v15 }
  0x4b   : > { %961 = vmatpush.bf16.msrb.mxu3 %v1462_v16  ;;  %920 = vmatmul.bf16.vlgmr.msrb.gmra.mxu0 %v1088_v21 }
  0x4c   : > { %968 = vmatpush.bf16.msra.mxu0 %v1477_v10  ;;  %948 = vmatmul.bf16.vlgmr.msrb.gmra.mxu2 %v1096_v22 }
  0x4d   : > { %934 = vmatmul.bf16.vlgmr.msrb.gmra.mxu1 %v1092_v23 }
  0x4e   : > { %962 = vmatmul.bf16.vlgmr.msrb.gmra.mxu3 %v1100_v24 }
  0x50   : > { %969 = vmatpush.bf16.msra.mxu0 %v1476_v25 }
  0x54   : > { %970 = vmatpush.bf16.msra.mxu0 %v1475_v26 }
  0x58   : > { %971 = vmatpush.bf16.msra.mxu0 %v1474_v27 }
  0x5c   : > { %972 = vmatpush.bf16.msra.mxu0 %v1473_v28 }
  0x60   : > { %973 = vmatpush.bf16.msra.mxu0 %v1472_v29 }
  0x64   : > { %974 = vmatpush.bf16.msra.mxu0 %v1471_v30 }
  0x68   : > { %975 = vmatpush.bf16.msra.mxu0 %v1470_v31 }
  0x6b   : > { %976 = vmatmul.bf16.vlgmr.msra.gmra.mxu0 %v1104_v34 }
  0xa8   : > { %v865_v35 = vpop.f32.mrf.mxu0 }
  0xa9   : > { %v866_v41 = vadd.f32 %v1496_v38, %v865_v35 }
  0xaa   : > { %v879_v36 = vpop.f32.mrf.mxu1 }
  0xab   : > { %v880_v43 = vadd.f32 %v879_v36, %v866_v41 }
  0xaf   : > { %v893_v37 = vpop.f32.mrf.mxu2 }
  0xb0   : > { %v867_v39 = vpop.f32.mrf.mxu0  ;;  %v894_v46 = vadd.f32 %v893_v37, %v880_v43 }
  0xb1   : > { %v907_v40 = vpop.f32.mrf.mxu3  ;;  %v868_v47 = vadd.f32 %v1496_v38, %v867_v39 }
  0xb2   : > { %v881_v42 = vpop.f32.mrf.mxu1  ;;  %v908_v49 = vadd.f32 %v907_v40, %v894_v46 }
  0xb3   : > { %v882_v50 = vadd.f32 %v881_v42, %v868_v47 }
  0xb7   : > { %v895_v44 = vpop.f32.mrf.mxu2 }
  0xb8   : > { %v896_v53 = vadd.f32 %v895_v44, %v882_v50 }
  0xb9   : > { %v909_v48 = vpop.f32.mrf.mxu3 }
  0xba   : > { %v910_v57 = vadd.f32 %v909_v48, %v896_v53 }
  0xc8   : > { %v921_v45 = vpop.f32.mrf.mxu0 }
  0xc9   : > { %v922_v54 = vadd.f32 %v921_v45, %v908_v49 }
  0xca   : > { %v935_v51 = vpop.f32.mrf.mxu1 }
  0xcb   : > { %v936_v58 = vadd.f32 %v935_v51, %v922_v54 }
  0xcf   : > { %v949_v52 = vpop.f32.mrf.mxu2 }
  0xd0   : > { %v923_v55 = vpop.f32.mrf.mxu0  ;;  %v950_v61 = vadd.f32 %v949_v52, %v936_v58 }
  0xd1   : > { %v963_v56 = vpop.f32.mrf.mxu3  ;;  %v924_v59 = vadd.f32 %v923_v55, %v910_v57 }
  0xd2   : > { %v937_v60 = vpop.f32.mrf.mxu1  ;;  %v964_v2 = vadd.f32 %v963_v56, %v950_v61 }
  0xd3   : > { %v938_v0 = vadd.f32 %v937_v60, %v924_v59 }
  0xd7   : > { %v951_v62 = vpop.f32.mrf.mxu2 }
  0xd8   : > { %v952_v3 = vadd.f32 %v951_v62, %v938_v0 }
  0xd9   : > { %v965_v4 = vpop.f32.mrf.mxu3 }
  0xda   : > { %v966_v7 = vadd.f32 %v965_v4, %v952_v3 }
  0xe8   : > { %v977_v63 = vpop.f32.mrf.mxu0 }
  0xe9   : > { %v978_v6 = vadd.f32 %v977_v63, %v964_v2 }
  0xeb   : > { %v984_v10 = vadd.f32 %v1480_v5, %v978_v6 }
  0xed   : > { %v986_v13 = vmax.f32 %v984_v10, 0.0 }
  0xf0   : > { %v979_v9 = vpop.f32.mrf.mxu0 }
  0xf1   : > { %v980_v11 = vadd.f32 %v979_v9, %v966_v7 }
  0xf3   : > { %v985_v12 = vadd.f32 %v1481_v8, %v980_v11 }
  0xf5   : > { %v987_v14 = vmax.f32 %v985_v12, 0.0 }
  0xf7   : > { %v1485_v15 = vpack.c.bf16 %v987_v14, %v986_v13 }
  0xf9   : > { %1486 = vst [vmem:[%s217_s5] sm:$0xff] %v1485_v15  }
  0xfa PF: > { %s14_s15 = sadd.s32 1, %s1503_s15  }
  0xfb   : > { %p11_p4 = scmp.ge.s32.totalorder %s14_s15, 4  }
  0xfd   :  { %13 = sbr.rel (!%p11_p4) target bundleno = 1 (0x1), region = 69 }

// kernel: specialized_resnet_imagenet_forward.8
= control target key start
LH: loop header
LB: loop body
LE: loop exit
PB: predicated region body
PF: predicated region fallthrough
CT: control target
= control target key end

     0   :  { %s1453_s12 = smov 0   ;;  %s1717_s0 = inlined_call_operand.vmem [shape: bf16[2,16,1152], index: 0, kind: input, shape index: {}]   ;;  %s1718_s1 = inlined_call_operand.vmem [shape: bf16[1152,128], index: 1, kind: input, shape index: {}]   ;;  %s1719_s2 = inlined_call_operand.vmem [shape: f32[1,128], index: 2, kind: input, shape index: {}]   ;;  %s1720_s3 = inlined_call_operand.vmem [shape: bf16[2,16,128], index: 3, kind: output, shape index: {}]  }
   0x1 LB: > { %s994_s13 = sadd.s32 4294967295, %s1431_s12   ;;  %p998_p0 = scmp.ge.s32.totalorder %s1431_s12, 1  ;;  %s1431_s12 = sphi %s1453_s12, %s13_s12  }
   0x2   : > { %p137_p1 = scmp.lt.s32.totalorder %s1431_s12, 3 }
   0x4   : > { %p138_p2 = pnand %p998_p0, %p137_p1 }
   0x5   : > { %p161_p3 = scmp.lt.s32.totalorder (!%p138_p2), %s994_s13, 1 }
   0x6   : > { %141 = sbr.rel (%p138_p2) target bundleno = 248 (0xf8), region = 32 }
   0xb   : > { %v1345_v0 = vld [vmem:[%s1718_s1 + $0x38] sm:$0xff]  ;;  %v1344_v4 = vld [vmem:[%s1718_s1 + $0x30] sm:$0xff]  ;;  %v1343_v8 = vld [vmem:[%s1718_s1 + $0x28] sm:$0xff]  ;;  %s1722_s13 = smov (!%p161_p3, %s994_s13), 1 }
   0xc   : > { %v1361_v1 = vld [vmem:[%s1718_s1 + $0xb8] sm:$0xff]  ;;  %807 = vmatpush.bf16.msra.mxu0 %v1345_v0  ;;  %v1360_v5 = vld [vmem:[%s1718_s1 + $0xb0] sm:$0xff]  ;;  %v1359_v9 = vld [vmem:[%s1718_s1 + $0xa8] sm:$0xff]  ;;  %s1415_s10 = smul.u32 72, %s1722_s13 }
   0xd   : > { %v1353_v2 = vld [vmem:[%s1718_s1 + $0x78] sm:$0xff]  ;;  %835 = vmatpush.bf16.msra.mxu2 %v1361_v1  ;;  %v1352_v6 = vld [vmem:[%s1718_s1 + $0x70] sm:$0xff]  ;;  %v1351_v10 = vld [vmem:[%s1718_s1 + $0x68] sm:$0xff] }
   0xe   : > { %v1369_v3 = vld [vmem:[%s1718_s1 + $0xf8] sm:$0xff]  ;;  %821 = vmatpush.bf16.msra.mxu1 %v1353_v2  ;;  %v1368_v7 = vld [vmem:[%s1718_s1 + $0xf0] sm:$0xff]  ;;  %v1367_v11 = vld [vmem:[%s1718_s1 + $0xe8] sm:$0xff]  ;;  %s1555_s23 = scalar_lea.vmem %s1717_s0, %s1415_s10 }
   0xf   : > { %849 = vmatpush.bf16.msra.mxu3 %v1369_v3  ;;  %v1342_v12 = vld [vmem:[%s1718_s1 + $0x20] sm:$0xff]  ;;  %v1341_v16 = vld [vmem:[%s1718_s1 + $0x18] sm:$0xff]  ;;  %v1340_v20 = vld [vmem:[%s1718_s1 + $0x10] sm:$0xff] }
  0x10   : > { %808 = vmatpush.bf16.msra.mxu0 %v1344_v4  ;;  %v1358_v13 = vld [vmem:[%s1718_s1 + $0xa0] sm:$0xff]  ;;  %v1357_v17 = vld [vmem:[%s1718_s1 + $0x98] sm:$0xff]  ;;  %v1356_v21 = vld [vmem:[%s1718_s1 + $0x90] sm:$0xff] }
  0x11   : > { %836 = vmatpush.bf16.msra.mxu2 %v1360_v5  ;;  %v1350_v14 = vld [vmem:[%s1718_s1 + $0x60] sm:$0xff]  ;;  %v1349_v18 = vld [vmem:[%s1718_s1 + $0x58] sm:$0xff]  ;;  %v1348_v22 = vld [vmem:[%s1718_s1 + $0x50] sm:$0xff] }
  0x12   : > { %822 = vmatpush.bf16.msra.mxu1 %v1352_v6  ;;  %v1366_v15 = vld [vmem:[%s1718_s1 + $0xe0] sm:$0xff]  ;;  %v1365_v19 = vld [vmem:[%s1718_s1 + $0xd8] sm:$0xff]  ;;  %v1364_v23 = vld [vmem:[%s1718_s1 + $0xd0] sm:$0xff] }
  0x13   : > { %850 = vmatpush.bf16.msra.mxu3 %v1368_v7  ;;  %v1339_v24 = vld [vmem:[%s1718_s1 + $0x8] sm:$0xff]  ;;  %v1338_v28 = vld [vmem:[%s1718_s1] sm:$0xff]  ;;  %v1377_v30 = vld [vmem:[%s1718_s1 + $0x138] sm:$0xff] }
  0x14   : > { %809 = vmatpush.bf16.msra.mxu0 %v1343_v8  ;;  %v1355_v25 = vld [vmem:[%s1718_s1 + $0x88] sm:$0xff]  ;;  %v1354_v29 = vld [vmem:[%s1718_s1 + $0x80] sm:$0xff]  ;;  %v1393_v31 = vld [vmem:[%s1718_s1 + $0x1b8] sm:$0xff] }
  0x15   : > { %837 = vmatpush.bf16.msra.mxu2 %v1359_v9  ;;  %v1347_v26 = vld [vmem:[%s1718_s1 + $0x48] sm:$0xff]  ;;  %v1346_v32 = vld [vmem:[%s1718_s1 + $0x40] sm:$0xff]  ;;  %v1385_v38 = vld [vmem:[%s1718_s1 + $0x178] sm:$0xff] }
  0x16   : > { %823 = vmatpush.bf16.msra.mxu1 %v1351_v10  ;;  %v1363_v27 = vld [vmem:[%s1718_s1 + $0xc8] sm:$0xff]  ;;  %v1362_v33 = vld [vmem:[%s1718_s1 + $0xc0] sm:$0xff]  ;;  %v1401_v39 = vld [vmem:[%s1718_s1 + $0x1f8] sm:$0xff] }
  0x17   : > { %851 = vmatpush.bf16.msra.mxu3 %v1367_v11  ;;  %v1004_v34 = vld [vmem:[%s1555_s23] sm:$0xf]  ;;  %v1333_v35 = vld [vmem:[%s1555_s23 + $0x20] sm:$0xf0]  ;;  %v1012_v36 = vld [vmem:[%s1555_s23 + $0x8] sm:$0xf] }
  0x18   : > { %810 = vmatpush.bf16.msra.mxu0 %v1342_v12  ;;  %v1334_v37 = vld [vmem:[%s1555_s23 + $0x28] sm:$0xf0]  ;;  %v1329_v40 = vld [vmem:[%s1555_s23 + $0x4] sm:$0xf]  ;;  %v1006_v41 = vld [vmem:[%s1555_s23 + $0x24] sm:$0xf0]  ;;  %v1005_v44 = vor.u32 %v1333_v35, %v1004_v34 }
  0x19   : > { %838 = vmatpush.bf16.msra.mxu2 %v1358_v13  ;;  %v1330_v42 = vld [vmem:[%s1555_s23 + $0xc] sm:$0xf]  ;;  %v1014_v43 = vld [vmem:[%s1555_s23 + $0x2c] sm:$0xf0]  ;;  %v1013_v45 = vor.u32 %v1334_v37, %v1012_v36  ;;  %v1009_v48 = vor.u32 %v1329_v40, %v1006_v41  ;;  %v1374_v56 = vld [vmem:[%s1718_s1 + $0x120] sm:$0xff] }
  0x1a   : > { %824 = vmatpush.bf16.msra.mxu1 %v1350_v14  ;;  %v1376_v46 = vld [vmem:[%s1718_s1 + $0x130] sm:$0xff]  ;;  %v1017_v49 = vor.u32 %v1330_v42, %v1014_v43  ;;  %v1375_v52 = vld [vmem:[%s1718_s1 + $0x128] sm:$0xff]  ;;  %v1390_v57 = vld [vmem:[%s1718_s1 + $0x1a0] sm:$0xff] }
  0x1b   : > { %852 = vmatpush.bf16.msra.mxu3 %v1366_v15  ;;  %v1392_v47 = vld [vmem:[%s1718_s1 + $0x1b0] sm:$0xff]  ;;  %v1391_v53 = vld [vmem:[%s1718_s1 + $0x1a8] sm:$0xff]  ;;  %v1382_v58 = vld [vmem:[%s1718_s1 + $0x160] sm:$0xff] }
  0x1c   : > { %811 = vmatpush.bf16.msra.mxu0 %v1341_v16  ;;  %v1384_v50 = vld [vmem:[%s1718_s1 + $0x170] sm:$0xff]  ;;  %v1383_v54 = vld [vmem:[%s1718_s1 + $0x168] sm:$0xff]  ;;  %v1398_v59 = vld [vmem:[%s1718_s1 + $0x1e0] sm:$0xff] }
  0x1d   : > { %839 = vmatpush.bf16.msra.mxu2 %v1357_v17  ;;  %v1400_v51 = vld [vmem:[%s1718_s1 + $0x1f0] sm:$0xff]  ;;  %v1399_v55 = vld [vmem:[%s1718_s1 + $0x1e8] sm:$0xff]  ;;  %v1373_v60 = vld [vmem:[%s1718_s1 + $0x118] sm:$0xff] }
  0x1e   : > { %825 = vmatpush.bf16.msra.mxu1 %v1349_v18  ;;  %v1389_v61 = vld [vmem:[%s1718_s1 + $0x198] sm:$0xff]  ;;  %v1372_v0 = vld [vmem:[%s1718_s1 + $0x110] sm:$0xff]  ;;  %v1371_v4 = vld [vmem:[%s1718_s1 + $0x108] sm:$0xff] }
  0x1f   : > { %853 = vmatpush.bf16.msra.mxu3 %v1365_v19  ;;  %v1381_v62 = vld [vmem:[%s1718_s1 + $0x158] sm:$0xff]  ;;  %v1388_v1 = vld [vmem:[%s1718_s1 + $0x190] sm:$0xff]  ;;  %v1387_v5 = vld [vmem:[%s1718_s1 + $0x188] sm:$0xff] }
  0x20   : > { %812 = vmatpush.bf16.msra.mxu0 %v1340_v20  ;;  %v1397_v63 = vld [vmem:[%s1718_s1 + $0x1d8] sm:$0xff]  ;;  %v1380_v2 = vld [vmem:[%s1718_s1 + $0x150] sm:$0xff]  ;;  %v1379_v6 = vld [vmem:[%s1718_s1 + $0x148] sm:$0xff] }
  0x21   : > { %840 = vmatpush.bf16.msra.mxu2 %v1356_v21  ;;  %v1396_v3 = vld [vmem:[%s1718_s1 + $0x1d0] sm:$0xff]  ;;  %v1395_v7 = vld [vmem:[%s1718_s1 + $0x1c8] sm:$0xff]  ;;  %v1370_v8 = vld [vmem:[%s1718_s1 + $0x100] sm:$0xff] }
  0x22   : > { %826 = vmatpush.bf16.msra.mxu1 %v1348_v22  ;;  %v1386_v9 = vld [vmem:[%s1718_s1 + $0x180] sm:$0xff]  ;;  %v1409_v10 = vld [vmem:[%s1718_s1 + $0x238] sm:$0xff]  ;;  %v1020_v11 = vld [vmem:[%s1555_s23 + $0x10] sm:$0xf] }
  0x23   : > { %854 = vmatpush.bf16.msra.mxu3 %v1364_v23  ;;  %v1335_v12 = vld [vmem:[%s1555_s23 + $0x30] sm:$0xf0]  ;;  %v1028_v13 = vld [vmem:[%s1555_s23 + $0x18] sm:$0xf]  ;;  %v1336_v14 = vld [vmem:[%s1555_s23 + $0x38] sm:$0xf0] }
  0x24   : > { %813 = vmatpush.bf16.msra.mxu0 %v1339_v24  ;;  %v1378_v15 = vld [vmem:[%s1718_s1 + $0x140] sm:$0xff]  ;;  %v1331_v17 = vld [vmem:[%s1555_s23 + $0x14] sm:$0xf]  ;;  %v1022_v18 = vld [vmem:[%s1555_s23 + $0x34] sm:$0xf0]  ;;  %v1021_v21 = vor.u32 %v1335_v12, %v1020_v11  ;;  %v1029_v22 = vor.u32 %v1336_v14, %v1028_v13 }
  0x25   : > { %841 = vmatpush.bf16.msra.mxu2 %v1355_v25  ;;  %v1394_v16 = vld [vmem:[%s1718_s1 + $0x1c0] sm:$0xff]  ;;  %v1332_v19 = vld [vmem:[%s1555_s23 + $0x1c] sm:$0xf]  ;;  %v1025_v23 = vor.u32 %v1331_v17, %v1022_v18  ;;  %v1408_v25 = vld [vmem:[%s1718_s1 + $0x230] sm:$0xff] }
  0x26   : > { %827 = vmatpush.bf16.msra.mxu1 %v1347_v26  ;;  %v1030_v20 = vld [vmem:[%s1555_s23 + $0x3c] sm:$0xf0]  ;;  %v1407_v26 = vld [vmem:[%s1718_s1 + $0x228] sm:$0xff] }
  0x27   : > { %855 = vmatpush.bf16.msra.mxu3 %v1363_v27  ;;  %v1033_v24 = vor.u32 %v1332_v19, %v1030_v20  ;;  %v1406_v27 = vld [vmem:[%s1718_s1 + $0x220] sm:$0xff] }
  0x28   : > { %814 = vmatpush.bf16.msra.mxu0 %v1338_v28  ;;  %v1405_v28 = vld [vmem:[%s1718_s1 + $0x218] sm:$0xff] }
  0x29   : > { %842 = vmatpush.bf16.msra.mxu2 %v1354_v29  ;;  %v1404_v29 = vld [vmem:[%s1718_s1 + $0x210] sm:$0xff] }
  0x2a   : > { %828 = vmatpush.bf16.msra.mxu1 %v1346_v32  ;;  %v1036_v32 = vld [vmem:[%s1555_s23 + $0x20] sm:$0xf] }
  0x2b   : > { %856 = vmatpush.bf16.msra.mxu3 %v1362_v33  ;;  %815 = vmatmul.bf16.vlgmr.msra.gmra.mxu0 %v1005_v44  ;;  %v1337_v33 = vld [vmem:[%s1555_s23 + $0x40] sm:$0xf0]  ;;  %s1328_s23 = sshll.u32 %s1722_s13, 3 }
  0x2c   : > { %863 = vmatpush.bf16.msrb.mxu0 %v1377_v30  ;;  %843 = vmatmul.bf16.vlgmr.msra.gmra.mxu2 %v1013_v45  ;;  %v1403_v30 = vld [vmem:[%s1718_s1 + $0x208] sm:$0xff]  ;;  %v1037_v34 = vor.u32 %v1337_v33, %v1036_v32  ;;  %s170_s19 = scalar_lea.vmem %s1720_s3, %s1328_s23 }
  0x2d   : > { %891 = vmatpush.bf16.msrb.mxu2 %v1393_v31  ;;  %829 = vmatmul.bf16.vlgmr.msra.gmra.mxu1 %v1009_v48  ;;  %v1402_v31 = vld [vmem:[%s1718_s1 + $0x200] sm:$0xff] }
  0x2e   : > { %877 = vmatpush.bf16.msrb.mxu1 %v1385_v38  ;;  %857 = vmatmul.bf16.vlgmr.msra.gmra.mxu3 %v1017_v49 }
  0x2f   : > { %905 = vmatpush.bf16.msrb.mxu3 %v1401_v39  ;;  %v1424_v39 = vld [vmem:[%s1719_s2] ss:$0 sm:$0xff] }
  0x30   : > { %864 = vmatpush.bf16.msrb.mxu0 %v1376_v46 }
  0x31   : > { %892 = vmatpush.bf16.msrb.mxu2 %v1392_v47 }
  0x32   : > { %878 = vmatpush.bf16.msrb.mxu1 %v1384_v50 }
  0x33   : > { %906 = vmatpush.bf16.msrb.mxu3 %v1400_v51 }
  0x34   : > { %865 = vmatpush.bf16.msrb.mxu0 %v1375_v52 }
  0x35   : > { %893 = vmatpush.bf16.msrb.mxu2 %v1391_v53 }
  0x36   : > { %879 = vmatpush.bf16.msrb.mxu1 %v1383_v54 }
  0x37   : > { %907 = vmatpush.bf16.msrb.mxu3 %v1399_v55 }
  0x38   : > { %866 = vmatpush.bf16.msrb.mxu0 %v1374_v56 }
  0x39   : > { %894 = vmatpush.bf16.msrb.mxu2 %v1390_v57 }
  0x3a   : > { %880 = vmatpush.bf16.msrb.mxu1 %v1382_v58 }
  0x3b   : > { %908 = vmatpush.bf16.msrb.mxu3 %v1398_v59 }
  0x3c   : > { %867 = vmatpush.bf16.msrb.mxu0 %v1373_v60 }
  0x3d   : > { %895 = vmatpush.bf16.msrb.mxu2 %v1389_v61 }
  0x3e   : > { %881 = vmatpush.bf16.msrb.mxu1 %v1381_v62 }
  0x3f   : > { %909 = vmatpush.bf16.msrb.mxu3 %v1397_v63 }
  0x40   : > { %868 = vmatpush.bf16.msrb.mxu0 %v1372_v0 }
  0x41   : > { %896 = vmatpush.bf16.msrb.mxu2 %v1388_v1 }
  0x42   : > { %882 = vmatpush.bf16.msrb.mxu1 %v1380_v2 }
  0x43   : > { %910 = vmatpush.bf16.msrb.mxu3 %v1396_v3 }
  0x44   : > { %869 = vmatpush.bf16.msrb.mxu0 %v1371_v4 }
  0x45   : > { %897 = vmatpush.bf16.msrb.mxu2 %v1387_v5 }
  0x46   : > { %883 = vmatpush.bf16.msrb.mxu1 %v1379_v6 }
  0x47   : > { %911 = vmatpush.bf16.msrb.mxu3 %v1395_v7 }
  0x48   : > { %870 = vmatpush.bf16.msrb.mxu0 %v1370_v8 }
  0x49   : > { %898 = vmatpush.bf16.msrb.mxu2 %v1386_v9 }
  0x4a   : > { %884 = vmatpush.bf16.msrb.mxu1 %v1378_v15 }
  0x4b   : > { %912 = vmatpush.bf16.msrb.mxu3 %v1394_v16  ;;  %871 = vmatmul.bf16.vlgmr.msrb.gmra.mxu0 %v1021_v21 }
  0x4c   : > { %919 = vmatpush.bf16.msra.mxu0 %v1409_v10  ;;  %899 = vmatmul.bf16.vlgmr.msrb.gmra.mxu2 %v1029_v22 }
  0x4d   : > { %885 = vmatmul.bf16.vlgmr.msrb.gmra.mxu1 %v1025_v23 }
  0x4e   : > { %913 = vmatmul.bf16.vlgmr.msrb.gmra.mxu3 %v1033_v24 }
  0x50   : > { %920 = vmatpush.bf16.msra.mxu0 %v1408_v25 }
  0x54   : > { %921 = vmatpush.bf16.msra.mxu0 %v1407_v26 }
  0x58   : > { %922 = vmatpush.bf16.msra.mxu0 %v1406_v27 }
  0x5c   : > { %923 = vmatpush.bf16.msra.mxu0 %v1405_v28 }
  0x60   : > { %924 = vmatpush.bf16.msra.mxu0 %v1404_v29 }
  0x64   : > { %925 = vmatpush.bf16.msra.mxu0 %v1403_v30 }
  0x68   : > { %926 = vmatpush.bf16.msra.mxu0 %v1402_v31 }
  0x6b   : > { %927 = vmatmul.bf16.vlgmr.msra.gmra.mxu0 %v1037_v34 }
  0xa8   : > { %v816_v35 = vpop.f32.mrf.mxu0 }
  0xa9   : > { %v817_v41 = vadd.f32 %v1424_v39, %v816_v35 }
  0xaa   : > { %v830_v36 = vpop.f32.mrf.mxu1 }
  0xab   : > { %v831_v44 = vadd.f32 %v830_v36, %v817_v41 }
  0xaf   : > { %v844_v37 = vpop.f32.mrf.mxu2 }
  0xb0   : > { %v818_v38 = vpop.f32.mrf.mxu0  ;;  %v845_v48 = vadd.f32 %v844_v37, %v831_v44 }
  0xb1   : > { %v858_v40 = vpop.f32.mrf.mxu3  ;;  %v819_v46 = vadd.f32 %v1424_v39, %v818_v38 }
  0xb2   : > { %v832_v42 = vpop.f32.mrf.mxu1  ;;  %v859_v51 = vadd.f32 %v858_v40, %v845_v48 }
  0xb3   : > { %v833_v49 = vadd.f32 %v832_v42, %v819_v46 }
  0xb7   : > { %v846_v43 = vpop.f32.mrf.mxu2 }
  0xb8   : > { %v847_v53 = vadd.f32 %v846_v43, %v833_v49 }
  0xb9   : > { %v860_v47 = vpop.f32.mrf.mxu3 }
  0xba   : > { %v861_v57 = vadd.f32 %v860_v47, %v847_v53 }
  0xc8   : > { %v872_v45 = vpop.f32.mrf.mxu0 }
  0xc9   : > { %v873_v55 = vadd.f32 %v872_v45, %v859_v51 }
  0xca   : > { %v886_v50 = vpop.f32.mrf.mxu1 }
  0xcb   : > { %v887_v58 = vadd.f32 %v886_v50, %v873_v55 }
  0xcf   : > { %v900_v52 = vpop.f32.mrf.mxu2 }
  0xd0   : > { %v874_v54 = vpop.f32.mrf.mxu0  ;;  %v901_v63 = vadd.f32 %v900_v52, %v887_v58 }
  0xd1   : > { %v914_v56 = vpop.f32.mrf.mxu3  ;;  %v875_v59 = vadd.f32 %v874_v54, %v861_v57 }
  0xd2   : > { %v888_v60 = vpop.f32.mrf.mxu1  ;;  %v915_v3 = vadd.f32 %v914_v56, %v901_v63 }
  0xd3   : > { %v889_v0 = vadd.f32 %v888_v60, %v875_v59 }
  0xd7   : > { %v902_v61 = vpop.f32.mrf.mxu2 }
  0xd8   : > { %v903_v1 = vadd.f32 %v902_v61, %v889_v0 }
  0xd9   : > { %v916_v2 = vpop.f32.mrf.mxu3 }
  0xda   : > { %v917_v4 = vadd.f32 %v916_v2, %v903_v1 }
  0xe8   : > { %v928_v62 = vpop.f32.mrf.mxu0 }
  0xe9   : > { %v929_v5 = vadd.f32 %v928_v62, %v915_v3 }
  0xeb   : > { %v933_v8 = vmax.f32 %v929_v5, 0.0 }
  0xf0   : > { %v930_v6 = vpop.f32.mrf.mxu0 }
  0xf1   : > { %v931_v7 = vadd.f32 %v930_v6, %v917_v4 }
  0xf3   : > { %v934_v9 = vmax.f32 %v931_v7, 0.0 }
  0xf5   : > { %v1413_v10 = vpack.c.bf16 %v934_v9, %v933_v8 }
  0xf7   : > { %1414 = vst [vmem:[%s170_s19] sm:$0xff] %v1413_v10  }
  0xf8 PF: > { %s13_s12 = sadd.s32 1, %s1431_s12  }
  0xf9   : > { %p10_p4 = scmp.ge.s32.totalorder %s13_s12, 4  }
  0xfb   :  { %12 = sbr.rel (!%p10_p4) target bundleno = 1 (0x1), region = 62 }

// kernel: specialized_resnet_imagenet_forward.9
= control target key start
LH: loop header
LB: loop body
LE: loop exit
PB: predicated region body
PF: predicated region fallthrough
CT: control target
= control target key end

     0   :  { %s1535_s15 = smov 0   ;;  %s1806_s0 = inlined_call_operand.vmem [shape: bf16[2,16,1152], index: 0, kind: input, shape index: {}]   ;;  %s1807_s1 = inlined_call_operand.vmem [shape: bf16[1152,128], index: 1, kind: input, shape index: {}]   ;;  %s1808_s2 = inlined_call_operand.vmem [shape: f32[1,128], index: 2, kind: input, shape index: {}]   ;;  %s1809_s3 = inlined_call_operand.vmem [shape: bf16[2,16,128], index: 3, kind: input, shape index: {}]   ;;  %s1810_s4 = inlined_call_operand.vmem [shape: f32[2,8,128], index: 4, kind: output, shape index: {}]  }
   0x1 LB: > { %s1067_s16 = sadd.s32 4294967295, %s1507_s15   ;;  %p1071_p0 = scmp.ge.s32.totalorder %s1507_s15, 1  ;;  %s1507_s15 = sphi %s1535_s15, %s14_s15  }
   0x2   : > { %p172_p1 = scmp.lt.s32.totalorder %s1507_s15, 3 }
   0x4   : > { %p173_p2 = pnand %p1071_p0, %p172_p1 }
   0x5   : > { %p202_p3 = scmp.lt.s32.totalorder (!%p173_p2), %s1067_s16, 1 }
   0x6   : > { %176 = sbr.rel (%p173_p2) target bundleno = 264 (0x108), region = 36 }
   0xb   : > { %v1419_v0 = vld [vmem:[%s1807_s1 + $0x38] sm:$0xff]  ;;  %v1418_v4 = vld [vmem:[%s1807_s1 + $0x30] sm:$0xff]  ;;  %v1417_v8 = vld [vmem:[%s1807_s1 + $0x28] sm:$0xff]  ;;  %s1812_s16 = smov (!%p202_p3, %s1067_s16), 1 }
   0xc   : > { %v1435_v1 = vld [vmem:[%s1807_s1 + $0xb8] sm:$0xff]  ;;  %854 = vmatpush.bf16.msra.mxu0 %v1419_v0  ;;  %v1434_v5 = vld [vmem:[%s1807_s1 + $0xb0] sm:$0xff]  ;;  %v1433_v9 = vld [vmem:[%s1807_s1 + $0xa8] sm:$0xff]  ;;  %s1488_s17 = smul.u32 72, %s1812_s16 }
   0xd   : > { %v1427_v2 = vld [vmem:[%s1807_s1 + $0x78] sm:$0xff]  ;;  %882 = vmatpush.bf16.msra.mxu2 %v1435_v1  ;;  %v1426_v6 = vld [vmem:[%s1807_s1 + $0x70] sm:$0xff]  ;;  %v1425_v10 = vld [vmem:[%s1807_s1 + $0x68] sm:$0xff] }
   0xe   : > { %v1443_v3 = vld [vmem:[%s1807_s1 + $0xf8] sm:$0xff]  ;;  %868 = vmatpush.bf16.msra.mxu1 %v1427_v2  ;;  %v1442_v7 = vld [vmem:[%s1807_s1 + $0xf0] sm:$0xff]  ;;  %v1441_v11 = vld [vmem:[%s1807_s1 + $0xe8] sm:$0xff]  ;;  %s1637_s28 = scalar_lea.vmem %s1806_s0, %s1488_s17 }
   0xf   : > { %896 = vmatpush.bf16.msra.mxu3 %v1443_v3  ;;  %v1416_v12 = vld [vmem:[%s1807_s1 + $0x20] sm:$0xff]  ;;  %v1415_v16 = vld [vmem:[%s1807_s1 + $0x18] sm:$0xff]  ;;  %v1414_v20 = vld [vmem:[%s1807_s1 + $0x10] sm:$0xff] }
  0x10   : > { %855 = vmatpush.bf16.msra.mxu0 %v1418_v4  ;;  %v1432_v13 = vld [vmem:[%s1807_s1 + $0xa0] sm:$0xff]  ;;  %v1431_v17 = vld [vmem:[%s1807_s1 + $0x98] sm:$0xff]  ;;  %v1430_v21 = vld [vmem:[%s1807_s1 + $0x90] sm:$0xff] }
  0x11   : > { %883 = vmatpush.bf16.msra.mxu2 %v1434_v5  ;;  %v1424_v14 = vld [vmem:[%s1807_s1 + $0x60] sm:$0xff]  ;;  %v1423_v18 = vld [vmem:[%s1807_s1 + $0x58] sm:$0xff]  ;;  %v1422_v22 = vld [vmem:[%s1807_s1 + $0x50] sm:$0xff] }
  0x12   : > { %869 = vmatpush.bf16.msra.mxu1 %v1426_v6  ;;  %v1440_v15 = vld [vmem:[%s1807_s1 + $0xe0] sm:$0xff]  ;;  %v1439_v19 = vld [vmem:[%s1807_s1 + $0xd8] sm:$0xff]  ;;  %v1438_v23 = vld [vmem:[%s1807_s1 + $0xd0] sm:$0xff] }
  0x13   : > { %897 = vmatpush.bf16.msra.mxu3 %v1442_v7  ;;  %v1413_v24 = vld [vmem:[%s1807_s1 + $0x8] sm:$0xff]  ;;  %v1412_v28 = vld [vmem:[%s1807_s1] sm:$0xff]  ;;  %v1451_v30 = vld [vmem:[%s1807_s1 + $0x138] sm:$0xff] }
  0x14   : > { %856 = vmatpush.bf16.msra.mxu0 %v1417_v8  ;;  %v1429_v25 = vld [vmem:[%s1807_s1 + $0x88] sm:$0xff]  ;;  %v1428_v29 = vld [vmem:[%s1807_s1 + $0x80] sm:$0xff]  ;;  %v1467_v31 = vld [vmem:[%s1807_s1 + $0x1b8] sm:$0xff] }
  0x15   : > { %884 = vmatpush.bf16.msra.mxu2 %v1433_v9  ;;  %v1421_v26 = vld [vmem:[%s1807_s1 + $0x48] sm:$0xff]  ;;  %v1420_v32 = vld [vmem:[%s1807_s1 + $0x40] sm:$0xff]  ;;  %v1459_v38 = vld [vmem:[%s1807_s1 + $0x178] sm:$0xff] }
  0x16   : > { %870 = vmatpush.bf16.msra.mxu1 %v1425_v10  ;;  %v1437_v27 = vld [vmem:[%s1807_s1 + $0xc8] sm:$0xff]  ;;  %v1436_v33 = vld [vmem:[%s1807_s1 + $0xc0] sm:$0xff]  ;;  %v1475_v39 = vld [vmem:[%s1807_s1 + $0x1f8] sm:$0xff] }
  0x17   : > { %898 = vmatpush.bf16.msra.mxu3 %v1441_v11  ;;  %v1078_v34 = vld [vmem:[%s1637_s28] sm:$0xf]  ;;  %v1407_v35 = vld [vmem:[%s1637_s28 + $0x20] sm:$0xf0]  ;;  %v1086_v36 = vld [vmem:[%s1637_s28 + $0x8] sm:$0xf] }
  0x18   : > { %857 = vmatpush.bf16.msra.mxu0 %v1416_v12  ;;  %v1408_v37 = vld [vmem:[%s1637_s28 + $0x28] sm:$0xf0]  ;;  %v1403_v40 = vld [vmem:[%s1637_s28 + $0x4] sm:$0xf]  ;;  %v1080_v41 = vld [vmem:[%s1637_s28 + $0x24] sm:$0xf0]  ;;  %v1079_v44 = vor.u32 %v1407_v35, %v1078_v34 }
  0x19   : > { %885 = vmatpush.bf16.msra.mxu2 %v1432_v13  ;;  %v1404_v42 = vld [vmem:[%s1637_s28 + $0xc] sm:$0xf]  ;;  %v1088_v43 = vld [vmem:[%s1637_s28 + $0x2c] sm:$0xf0]  ;;  %v1087_v45 = vor.u32 %v1408_v37, %v1086_v36  ;;  %v1083_v48 = vor.u32 %v1403_v40, %v1080_v41  ;;  %v1448_v56 = vld [vmem:[%s1807_s1 + $0x120] sm:$0xff] }
  0x1a   : > { %871 = vmatpush.bf16.msra.mxu1 %v1424_v14  ;;  %v1450_v46 = vld [vmem:[%s1807_s1 + $0x130] sm:$0xff]  ;;  %v1091_v49 = vor.u32 %v1404_v42, %v1088_v43  ;;  %v1449_v52 = vld [vmem:[%s1807_s1 + $0x128] sm:$0xff]  ;;  %v1464_v57 = vld [vmem:[%s1807_s1 + $0x1a0] sm:$0xff] }
  0x1b   : > { %899 = vmatpush.bf16.msra.mxu3 %v1440_v15  ;;  %v1466_v47 = vld [vmem:[%s1807_s1 + $0x1b0] sm:$0xff]  ;;  %v1465_v53 = vld [vmem:[%s1807_s1 + $0x1a8] sm:$0xff]  ;;  %v1456_v58 = vld [vmem:[%s1807_s1 + $0x160] sm:$0xff] }
  0x1c   : > { %858 = vmatpush.bf16.msra.mxu0 %v1415_v16  ;;  %v1458_v50 = vld [vmem:[%s1807_s1 + $0x170] sm:$0xff]  ;;  %v1457_v54 = vld [vmem:[%s1807_s1 + $0x168] sm:$0xff]  ;;  %v1472_v59 = vld [vmem:[%s1807_s1 + $0x1e0] sm:$0xff] }
  0x1d   : > { %886 = vmatpush.bf16.msra.mxu2 %v1431_v17  ;;  %v1474_v51 = vld [vmem:[%s1807_s1 + $0x1f0] sm:$0xff]  ;;  %v1473_v55 = vld [vmem:[%s1807_s1 + $0x1e8] sm:$0xff]  ;;  %v1447_v60 = vld [vmem:[%s1807_s1 + $0x118] sm:$0xff] }
  0x1e   : > { %872 = vmatpush.bf16.msra.mxu1 %v1423_v18  ;;  %v1463_v61 = vld [vmem:[%s1807_s1 + $0x198] sm:$0xff]  ;;  %v1446_v0 = vld [vmem:[%s1807_s1 + $0x110] sm:$0xff]  ;;  %v1445_v4 = vld [vmem:[%s1807_s1 + $0x108] sm:$0xff] }
  0x1f   : > { %900 = vmatpush.bf16.msra.mxu3 %v1439_v19  ;;  %v1455_v62 = vld [vmem:[%s1807_s1 + $0x158] sm:$0xff]  ;;  %v1462_v1 = vld [vmem:[%s1807_s1 + $0x190] sm:$0xff]  ;;  %v1461_v5 = vld [vmem:[%s1807_s1 + $0x188] sm:$0xff] }
  0x20   : > { %859 = vmatpush.bf16.msra.mxu0 %v1414_v20  ;;  %v1471_v63 = vld [vmem:[%s1807_s1 + $0x1d8] sm:$0xff]  ;;  %v1454_v2 = vld [vmem:[%s1807_s1 + $0x150] sm:$0xff]  ;;  %v1453_v6 = vld [vmem:[%s1807_s1 + $0x148] sm:$0xff] }
  0x21   : > { %887 = vmatpush.bf16.msra.mxu2 %v1430_v21  ;;  %v1470_v3 = vld [vmem:[%s1807_s1 + $0x1d0] sm:$0xff]  ;;  %v1469_v7 = vld [vmem:[%s1807_s1 + $0x1c8] sm:$0xff]  ;;  %v1444_v8 = vld [vmem:[%s1807_s1 + $0x100] sm:$0xff] }
  0x22   : > { %873 = vmatpush.bf16.msra.mxu1 %v1422_v22  ;;  %v1460_v9 = vld [vmem:[%s1807_s1 + $0x180] sm:$0xff]  ;;  %v1483_v10 = vld [vmem:[%s1807_s1 + $0x238] sm:$0xff]  ;;  %v1094_v11 = vld [vmem:[%s1637_s28 + $0x10] sm:$0xf] }
  0x23   : > { %901 = vmatpush.bf16.msra.mxu3 %v1438_v23  ;;  %v1409_v12 = vld [vmem:[%s1637_s28 + $0x30] sm:$0xf0]  ;;  %v1102_v13 = vld [vmem:[%s1637_s28 + $0x18] sm:$0xf]  ;;  %v1410_v14 = vld [vmem:[%s1637_s28 + $0x38] sm:$0xf0] }
  0x24   : > { %860 = vmatpush.bf16.msra.mxu0 %v1413_v24  ;;  %v1452_v15 = vld [vmem:[%s1807_s1 + $0x140] sm:$0xff]  ;;  %v1405_v17 = vld [vmem:[%s1637_s28 + $0x14] sm:$0xf]  ;;  %v1096_v18 = vld [vmem:[%s1637_s28 + $0x34] sm:$0xf0]  ;;  %v1095_v21 = vor.u32 %v1409_v12, %v1094_v11  ;;  %v1103_v22 = vor.u32 %v1410_v14, %v1102_v13 }
  0x25   : > { %888 = vmatpush.bf16.msra.mxu2 %v1429_v25  ;;  %v1468_v16 = vld [vmem:[%s1807_s1 + $0x1c0] sm:$0xff]  ;;  %v1406_v19 = vld [vmem:[%s1637_s28 + $0x1c] sm:$0xf]  ;;  %v1099_v23 = vor.u32 %v1405_v17, %v1096_v18  ;;  %v1482_v25 = vld [vmem:[%s1807_s1 + $0x230] sm:$0xff] }
  0x26   : > { %874 = vmatpush.bf16.msra.mxu1 %v1421_v26  ;;  %v1104_v20 = vld [vmem:[%s1637_s28 + $0x3c] sm:$0xf0]  ;;  %v1481_v26 = vld [vmem:[%s1807_s1 + $0x228] sm:$0xff] }
  0x27   : > { %902 = vmatpush.bf16.msra.mxu3 %v1437_v27  ;;  %v1107_v24 = vor.u32 %v1406_v19, %v1104_v20  ;;  %v1480_v27 = vld [vmem:[%s1807_s1 + $0x220] sm:$0xff] }
  0x28   : > { %861 = vmatpush.bf16.msra.mxu0 %v1412_v28  ;;  %v1479_v28 = vld [vmem:[%s1807_s1 + $0x218] sm:$0xff] }
  0x29   : > { %889 = vmatpush.bf16.msra.mxu2 %v1428_v29  ;;  %v1478_v29 = vld [vmem:[%s1807_s1 + $0x210] sm:$0xff] }
  0x2a   : > { %875 = vmatpush.bf16.msra.mxu1 %v1420_v32  ;;  %v1110_v32 = vld [vmem:[%s1637_s28 + $0x20] sm:$0xf] }
  0x2b   : > { %903 = vmatpush.bf16.msra.mxu3 %v1436_v33  ;;  %862 = vmatmul.bf16.vlgmr.msra.gmra.mxu0 %v1079_v44  ;;  %v1411_v33 = vld [vmem:[%s1637_s28 + $0x40] sm:$0xf0]  ;;  %s1402_s28 = sshll.u32 %s1812_s16, 3 }
  0x2c   : > { %910 = vmatpush.bf16.msrb.mxu0 %v1451_v30  ;;  %890 = vmatmul.bf16.vlgmr.msra.gmra.mxu2 %v1087_v45  ;;  %v1477_v30 = vld [vmem:[%s1807_s1 + $0x208] sm:$0xff]  ;;  %v1111_v34 = vor.u32 %v1411_v33, %v1110_v32  ;;  %s211_s29 = scalar_lea.vmem %s1809_s3, %s1402_s28  ;;  %s215_s6 = scalar_lea.vmem %s1810_s4, %s1402_s28 }
  0x2d   : > { %938 = vmatpush.bf16.msrb.mxu2 %v1467_v31  ;;  %876 = vmatmul.bf16.vlgmr.msra.gmra.mxu1 %v1083_v48  ;;  %v1476_v31 = vld [vmem:[%s1807_s1 + $0x200] sm:$0xff] }
  0x2e   : > { %924 = vmatpush.bf16.msrb.mxu1 %v1459_v38  ;;  %904 = vmatmul.bf16.vlgmr.msra.gmra.mxu3 %v1091_v49  ;;  %v1498_v38 = vld [vmem:[%s1808_s2] ss:$0 sm:$0xff] }
  0x2f   : > { %952 = vmatpush.bf16.msrb.mxu3 %v1475_v39 }
  0x30   : > { %911 = vmatpush.bf16.msrb.mxu0 %v1450_v46 }
  0x31   : > { %939 = vmatpush.bf16.msrb.mxu2 %v1466_v47 }
  0x32   : > { %925 = vmatpush.bf16.msrb.mxu1 %v1458_v50 }
  0x33   : > { %953 = vmatpush.bf16.msrb.mxu3 %v1474_v51 }
  0x34   : > { %912 = vmatpush.bf16.msrb.mxu0 %v1449_v52 }
  0x35   : > { %940 = vmatpush.bf16.msrb.mxu2 %v1465_v53 }
  0x36   : > { %926 = vmatpush.bf16.msrb.mxu1 %v1457_v54 }
  0x37   : > { %954 = vmatpush.bf16.msrb.mxu3 %v1473_v55 }
  0x38   : > { %913 = vmatpush.bf16.msrb.mxu0 %v1448_v56 }
  0x39   : > { %941 = vmatpush.bf16.msrb.mxu2 %v1464_v57 }
  0x3a   : > { %927 = vmatpush.bf16.msrb.mxu1 %v1456_v58 }
  0x3b   : > { %955 = vmatpush.bf16.msrb.mxu3 %v1472_v59 }
  0x3c   : > { %914 = vmatpush.bf16.msrb.mxu0 %v1447_v60 }
  0x3d   : > { %942 = vmatpush.bf16.msrb.mxu2 %v1463_v61 }
  0x3e   : > { %928 = vmatpush.bf16.msrb.mxu1 %v1455_v62 }
  0x3f   : > { %956 = vmatpush.bf16.msrb.mxu3 %v1471_v63 }
  0x40   : > { %915 = vmatpush.bf16.msrb.mxu0 %v1446_v0 }
  0x41   : > { %943 = vmatpush.bf16.msrb.mxu2 %v1462_v1  ;;  %v1509_v1 = vmov 16.0  }
  0x42   : > { %929 = vmatpush.bf16.msrb.mxu1 %v1454_v2  ;;  %1499 = vrcp.f32 %v1509_v1  ;;  %v1485_v2 = vld [vmem:[%s211_s29] sm:$0xff]  }
  0x43   : > { %957 = vmatpush.bf16.msrb.mxu3 %v1470_v3 }
  0x44   : > { %916 = vmatpush.bf16.msrb.mxu0 %v1445_v4 }
  0x45   : > { %944 = vmatpush.bf16.msrb.mxu2 %v1461_v5 }
  0x46   : > { %930 = vmatpush.bf16.msrb.mxu1 %v1453_v6  ;;  %v1486_v6 = vunpack.c.l.bf16 %v1485_v2 }
  0x47   : > { %958 = vmatpush.bf16.msrb.mxu3 %v1469_v7 }
  0x48   : > { %917 = vmatpush.bf16.msrb.mxu0 %v1444_v8  ;;  %v1500_v8 = vpop.eup %1499 }
  0x49   : > { %945 = vmatpush.bf16.msrb.mxu2 %v1460_v9  ;;  %v994_v14 = vmul.f32 16.0, %v1500_v8  ;;  %vm998_vm0 = vweird.f32 %v1500_v8 }
  0x4a   : > { %931 = vmatpush.bf16.msrb.mxu1 %v1452_v15 }
  0x4b   : > { %959 = vmatpush.bf16.msrb.mxu3 %v1468_v16  ;;  %918 = vmatmul.bf16.vlgmr.msrb.gmra.mxu0 %v1095_v21  ;;  %v995_v18 = vsub.f32 1.0, %v994_v14 }
  0x4c   : > { %966 = vmatpush.bf16.msra.mxu0 %v1483_v10  ;;  %946 = vmatmul.bf16.vlgmr.msrb.gmra.mxu2 %v1103_v22  ;;  %v1487_v10 = vunpack.c.h.bf16 %v1485_v2 }
  0x4d   : > { %932 = vmatmul.bf16.vlgmr.msrb.gmra.mxu1 %v1099_v23  ;;  %v996_v21 = vmul.f32 %v1500_v8, %v995_v18 }
  0x4e   : > { %960 = vmatmul.bf16.vlgmr.msrb.gmra.mxu3 %v1107_v24 }
  0x4f   : > { %v997_v24 = vadd.f32 %v1500_v8, %v996_v21 }
  0x50   : > { %967 = vmatpush.bf16.msra.mxu0 %v1482_v25 }
  0x54   : > { %968 = vmatpush.bf16.msra.mxu0 %v1481_v26 }
  0x58   : > { %969 = vmatpush.bf16.msra.mxu0 %v1480_v27  ;;  %v999_v27 = vsel %vm998_vm0, %v1500_v8, %v997_v24 }
  0x5c   : > { %970 = vmatpush.bf16.msra.mxu0 %v1479_v28 }
  0x60   : > { %971 = vmatpush.bf16.msra.mxu0 %v1478_v29 }
  0x64   : > { %972 = vmatpush.bf16.msra.mxu0 %v1477_v30 }
  0x68   : > { %973 = vmatpush.bf16.msra.mxu0 %v1476_v31 }
  0x6b   : > { %974 = vmatmul.bf16.vlgmr.msra.gmra.mxu0 %v1111_v34 }
  0xa8   : > { %v863_v35 = vpop.f32.mrf.mxu0 }
  0xa9   : > { %v864_v41 = vadd.f32 %v1498_v38, %v863_v35 }
  0xaa   : > { %v877_v36 = vpop.f32.mrf.mxu1 }
  0xab   : > { %v878_v43 = vadd.f32 %v877_v36, %v864_v41 }
  0xaf   : > { %v891_v37 = vpop.f32.mrf.mxu2 }
  0xb0   : > { %v865_v39 = vpop.f32.mrf.mxu0  ;;  %v892_v46 = vadd.f32 %v891_v37, %v878_v43 }
  0xb1   : > { %v905_v40 = vpop.f32.mrf.mxu3  ;;  %v866_v47 = vadd.f32 %v1498_v38, %v865_v39 }
  0xb2   : > { %v879_v42 = vpop.f32.mrf.mxu1  ;;  %v906_v49 = vadd.f32 %v905_v40, %v892_v46 }
  0xb3   : > { %v880_v50 = vadd.f32 %v879_v42, %v866_v47 }
  0xb7   : > { %v893_v44 = vpop.f32.mrf.mxu2 }
  0xb8   : > { %v894_v53 = vadd.f32 %v893_v44, %v880_v50 }
  0xb9   : > { %v907_v48 = vpop.f32.mrf.mxu3 }
  0xba   : > { %v908_v57 = vadd.f32 %v907_v48, %v894_v53 }
  0xc8   : > { %v919_v45 = vpop.f32.mrf.mxu0 }
  0xc9   : > { %v920_v54 = vadd.f32 %v919_v45, %v906_v49 }
  0xca   : > { %v933_v51 = vpop.f32.mrf.mxu1 }
  0xcb   : > { %v934_v58 = vadd.f32 %v933_v51, %v920_v54 }
  0xcf   : > { %v947_v52 = vpop.f32.mrf.mxu2 }
  0xd0   : > { %v921_v55 = vpop.f32.mrf.mxu0  ;;  %v948_v61 = vadd.f32 %v947_v52, %v934_v58 }
  0xd1   : > { %v961_v56 = vpop.f32.mrf.mxu3  ;;  %v922_v59 = vadd.f32 %v921_v55, %v908_v57 }
  0xd2   : > { %v935_v60 = vpop.f32.mrf.mxu1  ;;  %v962_v3 = vadd.f32 %v961_v56, %v948_v61 }
  0xd3   : > { %v936_v0 = vadd.f32 %v935_v60, %v922_v59 }
  0xd7   : > { %v949_v62 = vpop.f32.mrf.mxu2 }
  0xd8   : > { %v950_v4 = vadd.f32 %v949_v62, %v936_v0 }
  0xd9   : > { %v963_v5 = vpop.f32.mrf.mxu3 }
  0xda   : > { %v964_v9 = vadd.f32 %v963_v5, %v950_v4 }
  0xe8   : > { %v975_v63 = vpop.f32.mrf.mxu0 }
  0xe9   : > { %v976_v7 = vadd.f32 %v975_v63, %v962_v3 }
  0xeb   : > { %v982_v12 = vadd.f32 %v1486_v6, %v976_v7 }
  0xed   : > { %v984_v16 = vmax.f32 %v982_v12, 0.0 }
  0xf0   : > { %v977_v11 = vpop.f32.mrf.mxu0 }
  0xf1   : > { %v978_v13 = vadd.f32 %v977_v11, %v964_v9 }
  0xf3   : > { %v983_v15 = vadd.f32 %v1487_v10, %v978_v13 }
  0xf5   : > { %v985_v17 = vmax.f32 %v983_v15, 0.0 }
  0xf7   : > { %v986_v19 = vadd.f32 %v985_v17, %v984_v16 }
  0xf9   : > { %v987_v20 = vrot.slane %v986_v19, 4 }
  0xfb   : > { %v988_v22 = vadd.f32 %v987_v20, %v986_v19 }
  0xfd   : > { %v989_v23 = vrot.slane %v988_v22, 2 }
  0xff   : > { %v990_v25 = vadd.f32 %v989_v23, %v988_v22 }
 0x101   : > { %v991_v26 = vrot.slane %v990_v25, 1 }
 0x103   : > { %v992_v28 = vadd.f32 %v991_v26, %v990_v25 }
 0x105   : > { %v1000_v29 = vmul.f32 %v999_v27, %v992_v28 }
 0x107   : > { %1001 = vst [vmem:[%s215_s6] sm:$0xff] %v1000_v29 }
 0x108 PF: > { %s14_s15 = sadd.s32 1, %s1507_s15  }
 0x109   : > { %p11_p4 = scmp.ge.s32.totalorder %s14_s15, 4  }
 0x10b   :  { %13 = sbr.rel (!%p11_p4) target bundleno = 1 (0x1), region = 69 }

</bundles_post_ra>
